<compile_context>
chip_gen: v7x
topology: tpu7x:2x2x1
jax: 0.10.0
libtpu: 0.0.40
codegen_flags: <defaults>
</compile_context>

<pallas_src>
from functools import partial

import jax
import jax.numpy as jnp
from jax.experimental import pallas as pl
from jax.experimental.pallas import tpu as pltpu


# ----------------------------------------------------------------------------
# helpers
# ----------------------------------------------------------------------------
def _round_up(x, m):
    return (x + m - 1) // m * m


def _pad2(x, rows, cols):
    return jnp.pad(x, ((0, rows - x.shape[0]), (0, cols - x.shape[1])))


def _vmem_cap_bytes():
    """Per-generation scoped-VMEM cap: conservative on 64 MiB chips (v7x)."""
    phys = 64 << 20
    try:
        info = pltpu.get_tpu_info()
        phys = int(getattr(info, "vmem_capacity_bytes", phys))
    except Exception:
        pass
    return (100 << 20) if phys >= (128 << 20) else (48 << 20)


def _clamp_limit(need, cap):
    return int(min(max(2 * need, 32 << 20), cap))


# ----------------------------------------------------------------------------
# Pallas kernels
# ----------------------------------------------------------------------------
def _xw_kernel(x_ref, w_ref, y_ref):
    # Pre-pass (reassociated case only):  Y = X @ W_l  (bf16 out, f32 accumulate).
    y_ref[...] = jnp.dot(x_ref[...], w_ref[...],
                         preferred_element_type=jnp.float32).astype(y_ref.dtype)


def _sage_heavy_kernel(a_ref, y_ref, x_ref, *rest, post, y_resident, tk, apply_relu):
    """One (tm, f_out) row tile:
         out_i = dinv_i * aggregate_i + x_i @ W_r + b     [+ ReLU]
       aggregate_i = (B_i @ X) @ W_l  (post)  or  B_i @ (X @ W_l)  (reassoc),
       accumulated over K tiles of the int8 adjacency B in a resident f32 scratch."""
    if post:
        wl_ref, wr_ref, b_ref, dinv_ref, o_ref, acc_ref = rest
    else:
        wr_ref, b_ref, dinv_ref, o_ref, acc_ref = rest

    k = pl.program_id(1)

    @pl.when(k == 0)
    def _():
        acc_ref[...] = jnp.zeros_like(acc_ref)

    if y_resident:
        start = pl.multiple_of(k * tk, tk)
        y = y_ref[pl.ds(start, tk), :]
    else:
        y = y_ref[...]
    # int8 adjacency counts -> bf16 MXU operand (two explicit casts: i8 -> f32 -> bf16).
    a = a_ref[...].astype(jnp.float32).astype(jnp.bfloat16)
    acc_ref[...] += jnp.dot(a, y, preferred_element_type=jnp.float32)

    @pl.when(k == pl.num_programs(1) - 1)
    def _():
        if post:
            agg = jnp.dot(acc_ref[...].astype(jnp.bfloat16), wl_ref[...],
                          preferred_element_type=jnp.float32)
        else:
            agg = acc_ref[...]
        root = jnp.dot(x_ref[...], wr_ref[...],
                       preferred_element_type=jnp.float32) + b_ref[...]
        out = dinv_ref[...] * agg + root          # exact f32 1/deg row scale
        if apply_relu:
            out = jnp.maximum(out, 0.0)
        o_ref[...] = out.astype(o_ref.dtype)


# ----------------------------------------------------------------------------
# One SAGEConv layer
# ----------------------------------------------------------------------------
def sage_layer(adj, dinv, x_pad, w_l, w_r, b, *, tm, tk, apply_relu, out_dtype,
               vmem_cap, y_resident_max_bytes):
    """adj: (n_pad, n_pad) int8 message counts; dinv: (n_pad, 1) f32 1/deg;
    x_pad: (n_pad, f_in_pad) bf16; w_l/w_r: (f_in, f_out) f32; b: (1, f_out) f32."""
    n_pad, f_in_pad = x_pad.shape
    f_out = w_l.shape[1]
    f_out_pad = _round_up(f_out, 128)
    n_i, n_k = n_pad // tm, n_pad // tk

    wl_p = _pad2(w_l, f_in_pad, f_out_pad).astype(jnp.bfloat16)
    wr_p = _pad2(w_r, f_in_pad, f_out_pad).astype(jnp.bfloat16)
    b_p = _pad2(b, 1, f_out_pad).astype(jnp.float32)

    # Run the N^2 matmul at the narrower feature width.
    post = f_in_pad <= f_out_pad
    if post:
        y, f_y = x_pad, f_in_pad
    else:
        f_y = f_out_pad
        y = pl.pallas_call(
            _xw_kernel,
            out_shape=jax.ShapeDtypeStruct((n_pad, f_out_pad), jnp.bfloat16),
            grid_spec=pltpu.PrefetchScalarGridSpec(
                num_scalar_prefetch=0, grid=(n_i,),
                in_specs=[pl.BlockSpec((tm, f_in_pad), lambda i: (i, 0)),
                          pl.BlockSpec((f_in_pad, f_out_pad), lambda i: (0, 0))],
                out_specs=pl.BlockSpec((tm, f_out_pad), lambda i: (i, 0))),
            compiler_params=pltpu.CompilerParams(
                dimension_semantics=("parallel",),
                vmem_limit_bytes=_clamp_limit(
                    2 * (tm * f_in_pad + f_in_pad * f_out_pad + tm * f_out_pad) * 2
                    + (1 << 20), vmem_cap)),
        )(x_pad, wl_p)

    # Hold Y fully VMEM-resident when small: DMA'd from HBM once instead of once per
    # row tile; otherwise stream a (tk, f_y) tile per K step.
    y_bytes = n_pad * f_y * 2
    y_resident = y_bytes <= y_resident_max_bytes
    if y_resident:
        y_spec = pl.BlockSpec((n_pad, f_y), lambda i, k: (0, 0))
        y_buf = y_bytes
    else:
        y_spec = pl.BlockSpec((tk, f_y), lambda i, k: (k, 0))
        y_buf = tk * f_y * 2

    in_specs = [pl.BlockSpec((tm, tk), lambda i, k: (i, k)),        # int8 adjacency tile
                y_spec,                                             # aggregation operand
                pl.BlockSpec((tm, f_in_pad), lambda i, k: (i, 0))]  # X row tile (root path)
    inputs = [adj, y, x_pad]
    if post:
        in_specs.append(pl.BlockSpec((f_in_pad, f_out_pad), lambda i, k: (0, 0)))  # W_l
        inputs.append(wl_p)
    in_specs += [pl.BlockSpec((f_in_pad, f_out_pad), lambda i, k: (0, 0)),  # W_r
                 pl.BlockSpec((1, f_out_pad), lambda i, k: (0, 0)),         # bias
                 pl.BlockSpec((tm, 1), lambda i, k: (i, 0))]                # 1/deg
    inputs += [wr_p, b_p, dinv]
    # TODO(synk): mark the constant-index weight/bias blocks (and resident Y) with
    #             pipeline_mode=pl.Buffered(1) to drop their redundant second buffer.

    out_bytes = jnp.dtype(out_dtype).itemsize
    need = (2 * (tm * tk + y_buf + tm * f_in_pad * 2
                 + (f_in_pad * f_out_pad * 2 if post else 0)
                 + f_in_pad * f_out_pad * 2 + f_out_pad * 4 + tm * 4
                 + tm * f_out_pad * out_bytes)
            + tm * f_y * 4 + (1 << 20))

    return pl.pallas_call(
        partial(_sage_heavy_kernel, post=post, y_resident=y_resident,
                tk=tk, apply_relu=apply_relu),
        out_shape=jax.ShapeDtypeStruct((n_pad, f_out_pad), out_dtype),
        grid_spec=pltpu.PrefetchScalarGridSpec(
            num_scalar_prefetch=0,
            grid=(n_i, n_k),                                    # reduction axis last
            in_specs=in_specs,
            out_specs=pl.BlockSpec((tm, f_out_pad), lambda i, k: (i, 0)),
            scratch_shapes=[pltpu.VMEM((tm, f_y), jnp.float32)]),
        compiler_params=pltpu.CompilerParams(
            dimension_semantics=("parallel", "arbitrary"),
            vmem_limit_bytes=_clamp_limit(need, vmem_cap)),
    )(*inputs)


# ----------------------------------------------------------------------------
# Glue: adjacency counts + 1/deg from edge_index (plain JAX, not hot path)
# ----------------------------------------------------------------------------
def adjacency_and_degree(edge_index, num_nodes, n_pad):
    """int8 message-count matrix B (B[t, s] = #edges s->t) and f32 1/deg, zero-padded."""
    src, dst = edge_index[0], edge_index[1]
    counts = jnp.zeros((num_nodes, num_nodes), jnp.float32).at[dst, src].add(1.0)
    deg = counts.sum(axis=1, keepdims=True)
    dinv = 1.0 / jnp.maximum(deg, 1.0)          # zero in-degree -> agg = 0 (PyG semantics)
    adj = _pad2(counts, n_pad, n_pad).astype(jnp.int8)  # assumes <128 duplicates per pair
    return adj, _pad2(dinv, n_pad, 1)


# ----------------------------------------------------------------------------
# Parameter init and full model forward
# ----------------------------------------------------------------------------
def init_sage_params(key, in_channels, hidden_channels, out_channels, num_layers=2):
    dims = [in_channels] + [hidden_channels] * (num_layers - 1) + [out_channels]
    params = []
    for i in range(num_layers):
        f_in, f_out = dims[i], dims[i + 1]
        key, k1, k2, k3 = jax.random.split(key, 4)
        scale = (2.0 / (f_in + f_out)) ** 0.5
        w_l = scale * jax.random.normal(k1, (f_in, f_out), jnp.float32)  # lin_l.weight^T
        w_r = scale * jax.random.normal(k2, (f_in, f_out), jnp.float32)  # lin_r.weight^T
        b = 0.1 * jax.random.normal(k3, (1, f_out), jnp.float32)         # lin_l.bias
        params.append((w_l, w_r, b))
    return params


def graphsage_forward(params, x, edge_index, *, tm=512, tk=512,
                      y_resident_max_bytes=8 * 1024 * 1024):
    n, f_in = x.shape
    n_pad0 = _round_up(n, 128)

    # Tile sizes: multiples of 128; tm <= n_pad/2 so n_i >= 2 and both v7x TCs get row
    # tiles; tk divides tm so n_pad = round_up(n, tm) (no lcm padding blow-up).
    tm = max(128, min(tm, n_pad0)) // 128 * 128
    tm = min(tm, max(128, (n_pad0 // 2) // 128 * 128))
    tk = max(128, min(tk, tm)) // 128 * 128
    while tm % tk:
        tk -= 128
    n_pad = _round_up(n, tm)

    # Dense int8 adjacency (MXU-friendly).
    # TODO(synk): for large sparse graphs replace the dense B@X with a CSR neighbor
    #             gather (PrefetchScalarGridSpec offsets + manual double-buffered DMA).
    adj, dinv = adjacency_and_degree(edge_index, n, n_pad)

    f_in_pad = _round_up(f_in, 128)
    h = _pad2(x, n_pad, f_in_pad).astype(jnp.bfloat16)

    vmem_cap = _vmem_cap_bytes()
    num_layers = len(params)
    for i, (w_l, w_r, b) in enumerate(params):
        last = i == num_layers - 1
        h = sage_layer(adj, dinv, h, w_l, w_r, b, tm=tm, tk=tk,
                       apply_relu=not last,
                       out_dtype=jnp.float32 if last else jnp.bfloat16,
                       vmem_cap=vmem_cap,
                       y_resident_max_bytes=y_resident_max_bytes)
        # Dropout(0.2) is identity in eval mode.
        # TODO(synk): training-mode dropout (pltpu.prng_random_bits mask) not emitted.
    # TODO(synk): for small graphs, keep the int8 adjacency resident across both layers
    #             in a single pallas_call so it is read from HBM only once.
    f_out = params[-1][0].shape[1]
    return h[:n, :f_out]


# ----------------------------------------------------------------------------
# Reference (pure JAX, f32) for a sanity check
# ----------------------------------------------------------------------------
def graphsage_reference(params, x, edge_index):
    src, dst = edge_index[0], edge_index[1]
    counts = jnp.zeros((x.shape[0], x.shape[0]), jnp.float32).at[dst, src].add(1.0)
    a = counts / jnp.maximum(counts.sum(axis=1, keepdims=True), 1.0)
    h = x
    for i, (w_l, w_r, b) in enumerate(params):
        out = (a @ h) @ w_l + h @ w_r + b
        h = jnp.maximum(out, 0.0) if i < len(params) - 1 else out
    return h


if __name__ == "__main__":
    key = jax.random.PRNGKey(0)

    num_nodes = 256
    in_channels, hidden_channels, out_channels = 16, 256, 8
    num_edges = 1024

    k_x, k_src, k_dst, k_params = jax.random.split(key, 4)
    x = jax.random.normal(k_x, (num_nodes, in_channels), jnp.float32)
    src = jax.random.randint(k_src, (num_edges,), 0, num_nodes, jnp.int32)
    dst = jax.random.randint(k_dst, (num_edges,), 0, num_nodes, jnp.int32)
    edge_index = jnp.stack([src, dst], axis=0)  # (2, E): row 0 = source, row 1 = target

    params = init_sage_params(k_params, in_channels, hidden_channels, out_channels,
                              num_layers=2)
    ref = graphsage_reference(params, x, edge_index)

    # Default tiles clamp to tm=tk=128 for this 256-node graph -> heavy grid (2, 2),
    # exercising the K-accumulation loop, both heavy variants (layer 1 post-multiply,
    # layer 2 reassociated) and the fused root/bias/ReLU epilogue.  Run with Y held
    # VMEM-resident and with Y streamed per K tile to cover both code paths.
    configs = (("resident", jax.jit(graphsage_forward)),
               ("streamed", jax.jit(partial(graphsage_forward, y_resident_max_bytes=0))))
    for name, fwd in configs:
        out = jax.block_until_ready(fwd(params, x, edge_index))
        assert out.shape == (num_nodes, out_channels)
        max_err = float(jnp.max(jnp.abs(out - ref)))
        rel_l2 = float(jnp.linalg.norm(out - ref) / (jnp.linalg.norm(ref) + 1e-12))
        # bf16 MXU inputs => compare against the pure-f32 reference with loose tolerance.
        assert max_err < 1e-1 and rel_l2 < 2e-2, (name, max_err, rel_l2)

    print("KERNEL_OK")
</pallas_src>

<mosaic_0001>
module attributes {stable_mosaic.version = 11 : i64} {
  func.func private @main(%arg0: i32) attributes {dimension_semantics = [#tpu.dimension_semantics<core_parallel>], iteration_bounds = array<i64: 2>, tpu.core_type = #tpu.core_type<sc_scalar_subcore>, window_params = []} {
    return
  }
}

module attributes {stable_mosaic.version = 11 : i64} {
  func.func private @main(%arg0: i32) attributes {dimension_semantics = [#tpu.dimension_semantics<core_parallel>], iteration_bounds = array<i64: 2>, tpu.core_type = #tpu.core_type<sc_scalar_subcore>, window_params = []} {
    return
  }
}

module attributes {stable_mosaic.version = 11 : i64} {
  func.func @_xw_kernel(%arg0: i32, %arg1: memref<128x256xbf16, #tpu.memory_space<vmem>>, %arg2: memref<256x128xbf16, #tpu.memory_space<vmem>>, %arg3: memref<128x128xbf16, #tpu.memory_space<vmem>>) attributes {dimension_semantics = [#tpu.dimension_semantics<parallel>], iteration_bounds = array<i64: 2>, scalar_prefetch = 0 : i64, scratch_operands = 0 : i64, tpu.core_type = #tpu.core_type<tc>, window_params = [{transform_indices = @transform_0, window_bounds = array<i64: 128, 256>}, {pipeline_mode = #tpu.pipeline_mode<synchronous>, transform_indices = @transform_1, window_bounds = array<i64: 256, 128>}, {transform_indices = @transform_2, window_bounds = array<i64: 128, 128>}]} {
    %c0 = arith.constant 0 : index
    %c0_0 = arith.constant 0 : index
    %0 = vector.load %arg1[%c0, %c0_0] : memref<128x256xbf16, #tpu.memory_space<vmem>>, vector<128x256xbf16>
    %c0_1 = arith.constant 0 : index
    %c0_2 = arith.constant 0 : index
    %1 = vector.load %arg2[%c0_1, %c0_2] : memref<256x128xbf16, #tpu.memory_space<vmem>>, vector<256x128xbf16>
    %cst = arith.constant dense<0.000000e+00> : vector<128x128xf32>
    %2 = tpu.matmul %0, %1, %cst {dimension_numbers = #tpu.dot_dimension_numbers<[1], [0], [0], [1], [0, 0, 1, 1], [], []>} : vector<128x256xbf16>, vector<256x128xbf16>, vector<128x128xf32> -> vector<128x128xf32>
    %3 = arith.truncf %2 : vector<128x128xf32> to vector<128x128xbf16>
    %c0_3 = arith.constant 0 : index
    %c0_4 = arith.constant 0 : index
    %4 = vector.load %arg3[%c0_3, %c0_4] : memref<128x128xbf16, #tpu.memory_space<vmem>>, vector<128x128xbf16>
    tpu.vector_store %arg3[%c0_3, %c0_4], %3 {strides = array<i32>} : memref<128x128xbf16, #tpu.memory_space<vmem>>, vector<128x128xbf16>,
    return
  }
  func.func @transform_0(%arg0: i32) -> (i32, i32) {
    %c0_i32 = arith.constant 0 : i32
    %c0_i32_0 = arith.constant 0 : i32
    return %arg0, %c0_i32 : i32, i32
  }
  func.func @transform_1(%arg0: i32) -> (i32, i32) {
    %c0_i32 = arith.constant 0 : i32
    %c0_i32_0 = arith.constant 0 : i32
    %c0_i32_1 = arith.constant 0 : i32
    return %c0_i32, %c0_i32_0 : i32, i32
  }
  func.func @transform_2(%arg0: i32) -> (i32, i32) {
    %c0_i32 = arith.constant 0 : i32
    %c0_i32_0 = arith.constant 0 : i32
    return %arg0, %c0_i32 : i32, i32
  }
}

module attributes {stable_mosaic.version = 11 : i64} {
  func.func @_sage_heavy_kernel(%arg0: i32, %arg1: i32, %arg2: memref<128x128xi8, #tpu.memory_space<vmem>>, %arg3: memref<256x128xbf16, #tpu.memory_space<vmem>>, %arg4: memref<128x128xbf16, #tpu.memory_space<vmem>>, %arg5: memref<128x256xbf16, #tpu.memory_space<vmem>>, %arg6: memref<128x256xbf16, #tpu.memory_space<vmem>>, %arg7: memref<1x256xf32, #tpu.memory_space<vmem>>, %arg8: memref<128x1xf32, #tpu.memory_space<vmem>>, %arg9: memref<128x256xbf16, #tpu.memory_space<vmem>>, %arg10: memref<128x128xf32, #tpu.memory_space<vmem>>) attributes {dimension_semantics = [#tpu.dimension_semantics<parallel>, #tpu.dimension_semantics<arbitrary>], iteration_bounds = array<i64: 2, 2>, scalar_prefetch = 0 : i64, scratch_operands = 1 : i64, tpu.core_type = #tpu.core_type<tc>, window_params = [{transform_indices = @transform_0, window_bounds = array<i64: 128, 128>}, {pipeline_mode = #tpu.pipeline_mode<synchronous>, transform_indices = @transform_1, window_bounds = array<i64: 256, 128>}, {transform_indices = @transform_2, window_bounds = array<i64: 128, 128>}, {pipeline_mode = #tpu.pipeline_mode<synchronous>, transform_indices = @transform_3, window_bounds = array<i64: 128, 256>}, {pipeline_mode = #tpu.pipeline_mode<synchronous>, transform_indices = @transform_4, window_bounds = array<i64: 128, 256>}, {pipeline_mode = #tpu.pipeline_mode<synchronous>, transform_indices = @transform_5, window_bounds = array<i64: 1, 256>}, {transform_indices = @transform_6, window_bounds = array<i64: 128, 1>}, {transform_indices = @transform_7, window_bounds = array<i64: 128, 256>}]} {
    %c0_i32 = arith.constant 0 : i32
    %0 = arith.cmpi eq, %arg1, %c0_i32 : i32
    %1 = arith.extui %0 : i1 to i32
    %c0_i32_0 = arith.constant 0 : i32
    %2 = arith.cmpi ne, %1, %c0_i32_0 : i32
    scf.if %2 {
      %cst_8 = arith.constant 0.000000e+00 : f32
      %17 = vector.broadcast %cst_8 : f32 to vector<128x128xf32>
      %c0_9 = arith.constant 0 : index
      %c0_10 = arith.constant 0 : index
      %18 = vector.load %arg10[%c0_9, %c0_10] : memref<128x128xf32, #tpu.memory_space<vmem>>, vector<128x128xf32>
      tpu.vector_store %arg10[%c0_9, %c0_10], %17 {strides = array<i32>} : memref<128x128xf32, #tpu.memory_space<vmem>>, vector<128x128xf32>,
    } else {
    }
    %c128_i32 = arith.constant 128 : i32
    %3 = arith.muli %arg1, %c128_i32 : i32
    %4 = tpu.assume_multiple %3, 128 : i32
    %5 = arith.index_cast %4 : i32 to index
    %c0 = arith.constant 0 : index
    %6 = vector.load %arg3[%5, %c0] : memref<256x128xbf16, #tpu.memory_space<vmem>>, vector<128x128xbf16>
    %c0_1 = arith.constant 0 : index
    %c0_2 = arith.constant 0 : index
    %7 = vector.load %arg2[%c0_1, %c0_2] : memref<128x128xi8, #tpu.memory_space<vmem>>, vector<128x128xi8>
    %8 = arith.sitofp %7 : vector<128x128xi8> to vector<128x128xf32>
    %9 = arith.truncf %8 : vector<128x128xf32> to vector<128x128xbf16>
    %c0_3 = arith.constant 0 : index
    %c0_4 = arith.constant 0 : index
    %10 = vector.load %arg10[%c0_3, %c0_4] : memref<128x128xf32, #tpu.memory_space<vmem>>, vector<128x128xf32>
    %cst = arith.constant dense<0.000000e+00> : vector<128x128xf32>
    %11 = tpu.matmul %9, %6, %cst {dimension_numbers = #tpu.dot_dimension_numbers<[1], [0], [0], [1], [0, 0, 1, 1], [], []>} : vector<128x128xbf16>, vector<128x128xbf16>, vector<128x128xf32> -> vector<128x128xf32>
    %12 = arith.addf %10, %11 : vector<128x128xf32>
    %c0_5 = arith.constant 0 : index
    %c0_6 = arith.constant 0 : index
    %13 = vector.load %arg10[%c0_5, %c0_6] : memref<128x128xf32, #tpu.memory_space<vmem>>, vector<128x128xf32>
    tpu.vector_store %arg10[%c0_5, %c0_6], %12 {strides = array<i32>} : memref<128x128xf32, #tpu.memory_space<vmem>>, vector<128x128xf32>,
    %c1_i32 = arith.constant 1 : i32
    %14 = arith.cmpi eq, %arg1, %c1_i32 : i32
    %15 = arith.extui %14 : i1 to i32
    %c0_i32_7 = arith.constant 0 : i32
    %16 = arith.cmpi ne, %15, %c0_i32_7 : i32
    scf.if %16 {
      %c0_8 = arith.constant 0 : index
      %c0_9 = arith.constant 0 : index
      %17 = vector.load %arg10[%c0_8, %c0_9] : memref<128x128xf32, #tpu.memory_space<vmem>>, vector<128x128xf32>
      %18 = arith.truncf %17 : vector<128x128xf32> to vector<128x128xbf16>
      %c0_10 = arith.constant 0 : index
      %c0_11 = arith.constant 0 : index
      %19 = vector.load %arg5[%c0_10, %c0_11] : memref<128x256xbf16, #tpu.memory_space<vmem>>, vector<128x256xbf16>
      %cst_12 = arith.constant dense<0.000000e+00> : vector<128x256xf32>
      %20 = tpu.matmul %18, %19, %cst_12 {dimension_numbers = #tpu.dot_dimension_numbers<[1], [0], [0], [1], [0, 0, 1, 1], [], []>} : vector<128x128xbf16>, vector<128x256xbf16>, vector<128x256xf32> -> vector<128x256xf32>
      %c0_13 = arith.constant 0 : index
      %c0_14 = arith.constant 0 : index
      %21 = vector.load %arg4[%c0_13, %c0_14] : memref<128x128xbf16, #tpu.memory_space<vmem>>, vector<128x128xbf16>
      %c0_15 = arith.constant 0 : index
      %c0_16 = arith.constant 0 : index
      %22 = vector.load %arg6[%c0_15, %c0_16] : memref<128x256xbf16, #tpu.memory_space<vmem>>, vector<128x256xbf16>
      %cst_17 = arith.constant dense<0.000000e+00> : vector<128x256xf32>
      %23 = tpu.matmul %21, %22, %cst_17 {dimension_numbers = #tpu.dot_dimension_numbers<[1], [0], [0], [1], [0, 0, 1, 1], [], []>} : vector<128x128xbf16>, vector<128x256xbf16>, vector<128x256xf32> -> vector<128x256xf32>
      %c0_18 = arith.constant 0 : index
      %c0_19 = arith.constant 0 : index
      %24 = vector.load %arg7[%c0_18, %c0_19] : memref<1x256xf32, #tpu.memory_space<vmem>>, vector<1x256xf32>
      %25 = vector.broadcast %24 : vector<1x256xf32> to vector<128x256xf32>
      %26 = arith.addf %23, %25 : vector<128x256xf32>
      %c0_20 = arith.constant 0 : index
      %c0_21 = arith.constant 0 : index
      %27 = vector.load %arg8[%c0_20, %c0_21] : memref<128x1xf32, #tpu.memory_space<vmem>>, vector<128x1xf32>
      %28 = vector.broadcast %27 : vector<128x1xf32> to vector<128x256xf32>
      %29 = arith.mulf %28, %20 : vector<128x256xf32>
      %30 = arith.addf %29, %26 : vector<128x256xf32>
      %cst_22 = arith.constant 0.000000e+00 : f32
      %31 = vector.broadcast %cst_22 : f32 to vector<128x256xf32>
      %32 = arith.maximumf %30, %31 : vector<128x256xf32>
      %33 = arith.truncf %32 : vector<128x256xf32> to vector<128x256xbf16>
      %c0_23 = arith.constant 0 : index
      %c0_24 = arith.constant 0 : index
      %34 = vector.load %arg9[%c0_23, %c0_24] : memref<128x256xbf16, #tpu.memory_space<vmem>>, vector<128x256xbf16>
      tpu.vector_store %arg9[%c0_23, %c0_24], %33 {strides = array<i32>} : memref<128x256xbf16, #tpu.memory_space<vmem>>, vector<128x256xbf16>,
    } else {
    }
    return
  }
  func.func @transform_0(%arg0: i32, %arg1: i32) -> (i32, i32) {
    %c0_i32 = arith.constant 0 : i32
    return %arg0, %arg1 : i32, i32
  }
  func.func @transform_1(%arg0: i32, %arg1: i32) -> (i32, i32) {
    %c0_i32 = arith.constant 0 : i32
    %c0_i32_0 = arith.constant 0 : i32
    %c0_i32_1 = arith.constant 0 : i32
    return %c0_i32, %c0_i32_0 : i32, i32
  }
  func.func @transform_2(%arg0: i32, %arg1: i32) -> (i32, i32) {
    %c0_i32 = arith.constant 0 : i32
    %c0_i32_0 = arith.constant 0 : i32
    return %arg0, %c0_i32 : i32, i32
  }
  func.func @transform_3(%arg0: i32, %arg1: i32) -> (i32, i32) {
    %c0_i32 = arith.constant 0 : i32
    %c0_i32_0 = arith.constant 0 : i32
    %c0_i32_1 = arith.constant 0 : i32
    return %c0_i32, %c0_i32_0 : i32, i32
  }
  func.func @transform_4(%arg0: i32, %arg1: i32) -> (i32, i32) {
    %c0_i32 = arith.constant 0 : i32
    %c0_i32_0 = arith.constant 0 : i32
    %c0_i32_1 = arith.constant 0 : i32
    return %c0_i32, %c0_i32_0 : i32, i32
  }
  func.func @transform_5(%arg0: i32, %arg1: i32) -> (i32, i32) {
    %c0_i32 = arith.constant 0 : i32
    %c0_i32_0 = arith.constant 0 : i32
    %c0_i32_1 = arith.constant 0 : i32
    return %c0_i32, %c0_i32_0 : i32, i32
  }
  func.func @transform_6(%arg0: i32, %arg1: i32) -> (i32, i32) {
    %c0_i32 = arith.constant 0 : i32
    %c0_i32_0 = arith.constant 0 : i32
    return %arg0, %c0_i32 : i32, i32
  }
  func.func @transform_7(%arg0: i32, %arg1: i32) -> (i32, i32) {
    %c0_i32 = arith.constant 0 : i32
    %c0_i32_0 = arith.constant 0 : i32
    return %arg0, %c0_i32 : i32, i32
  }
}

module attributes {stable_mosaic.version = 11 : i64} {
  func.func @_sage_heavy_kernel(%arg0: i32, %arg1: i32, %arg2: memref<128x128xi8, #tpu.memory_space<vmem>>, %arg3: memref<256x128xbf16, #tpu.memory_space<vmem>>, %arg4: memref<128x256xbf16, #tpu.memory_space<vmem>>, %arg5: memref<256x128xbf16, #tpu.memory_space<vmem>>, %arg6: memref<1x128xf32, #tpu.memory_space<vmem>>, %arg7: memref<128x1xf32, #tpu.memory_space<vmem>>, %arg8: memref<128x128xf32, #tpu.memory_space<vmem>>, %arg9: memref<128x128xf32, #tpu.memory_space<vmem>>) attributes {dimension_semantics = [#tpu.dimension_semantics<parallel>, #tpu.dimension_semantics<arbitrary>], iteration_bounds = array<i64: 2, 2>, scalar_prefetch = 0 : i64, scratch_operands = 1 : i64, tpu.core_type = #tpu.core_type<tc>, window_params = [{transform_indices = @transform_0, window_bounds = array<i64: 128, 128>}, {pipeline_mode = #tpu.pipeline_mode<synchronous>, transform_indices = @transform_1, window_bounds = array<i64: 256, 128>}, {transform_indices = @transform_2, window_bounds = array<i64: 128, 256>}, {pipeline_mode = #tpu.pipeline_mode<synchronous>, transform_indices = @transform_3, window_bounds = array<i64: 256, 128>}, {pipeline_mode = #tpu.pipeline_mode<synchronous>, transform_indices = @transform_4, window_bounds = array<i64: 1, 128>}, {transform_indices = @transform_5, window_bounds = array<i64: 128, 1>}, {transform_indices = @transform_6, window_bounds = array<i64: 128, 128>}]} {
    %c0_i32 = arith.constant 0 : i32
    %0 = arith.cmpi eq, %arg1, %c0_i32 : i32
    %1 = arith.extui %0 : i1 to i32
    %c0_i32_0 = arith.constant 0 : i32
    %2 = arith.cmpi ne, %1, %c0_i32_0 : i32
    scf.if %2 {
      %cst_8 = arith.constant 0.000000e+00 : f32
      %17 = vector.broadcast %cst_8 : f32 to vector<128x128xf32>
      %c0_9 = arith.constant 0 : index
      %c0_10 = arith.constant 0 : index
      %18 = vector.load %arg9[%c0_9, %c0_10] : memref<128x128xf32, #tpu.memory_space<vmem>>, vector<128x128xf32>
      tpu.vector_store %arg9[%c0_9, %c0_10], %17 {strides = array<i32>} : memref<128x128xf32, #tpu.memory_space<vmem>>, vector<128x128xf32>,
    } else {
    }
    %c128_i32 = arith.constant 128 : i32
    %3 = arith.muli %arg1, %c128_i32 : i32
    %4 = tpu.assume_multiple %3, 128 : i32
    %5 = arith.index_cast %4 : i32 to index
    %c0 = arith.constant 0 : index
    %6 = vector.load %arg3[%5, %c0] : memref<256x128xbf16, #tpu.memory_space<vmem>>, vector<128x128xbf16>
    %c0_1 = arith.constant 0 : index
    %c0_2 = arith.constant 0 : index
    %7 = vector.load %arg2[%c0_1, %c0_2] : memref<128x128xi8, #tpu.memory_space<vmem>>, vector<128x128xi8>
    %8 = arith.sitofp %7 : vector<128x128xi8> to vector<128x128xf32>
    %9 = arith.truncf %8 : vector<128x128xf32> to vector<128x128xbf16>
    %c0_3 = arith.constant 0 : index
    %c0_4 = arith.constant 0 : index
    %10 = vector.load %arg9[%c0_3, %c0_4] : memref<128x128xf32, #tpu.memory_space<vmem>>, vector<128x128xf32>
    %cst = arith.constant dense<0.000000e+00> : vector<128x128xf32>
    %11 = tpu.matmul %9, %6, %cst {dimension_numbers = #tpu.dot_dimension_numbers<[1], [0], [0], [1], [0, 0, 1, 1], [], []>} : vector<128x128xbf16>, vector<128x128xbf16>, vector<128x128xf32> -> vector<128x128xf32>
    %12 = arith.addf %10, %11 : vector<128x128xf32>
    %c0_5 = arith.constant 0 : index
    %c0_6 = arith.constant 0 : index
    %13 = vector.load %arg9[%c0_5, %c0_6] : memref<128x128xf32, #tpu.memory_space<vmem>>, vector<128x128xf32>
    tpu.vector_store %arg9[%c0_5, %c0_6], %12 {strides = array<i32>} : memref<128x128xf32, #tpu.memory_space<vmem>>, vector<128x128xf32>,
    %c1_i32 = arith.constant 1 : i32
    %14 = arith.cmpi eq, %arg1, %c1_i32 : i32
    %15 = arith.extui %14 : i1 to i32
    %c0_i32_7 = arith.constant 0 : i32
    %16 = arith.cmpi ne, %15, %c0_i32_7 : i32
    scf.if %16 {
      %c0_8 = arith.constant 0 : index
      %c0_9 = arith.constant 0 : index
      %17 = vector.load %arg9[%c0_8, %c0_9] : memref<128x128xf32, #tpu.memory_space<vmem>>, vector<128x128xf32>
      %c0_10 = arith.constant 0 : index
      %c0_11 = arith.constant 0 : index
      %18 = vector.load %arg4[%c0_10, %c0_11] : memref<128x256xbf16, #tpu.memory_space<vmem>>, vector<128x256xbf16>
      %c0_12 = arith.constant 0 : index
      %c0_13 = arith.constant 0 : index
      %19 = vector.load %arg5[%c0_12, %c0_13] : memref<256x128xbf16, #tpu.memory_space<vmem>>, vector<256x128xbf16>
      %cst_14 = arith.constant dense<0.000000e+00> : vector<128x128xf32>
      %20 = tpu.matmul %18, %19, %cst_14 {dimension_numbers = #tpu.dot_dimension_numbers<[1], [0], [0], [1], [0, 0, 1, 1], [], []>} : vector<128x256xbf16>, vector<256x128xbf16>, vector<128x128xf32> -> vector<128x128xf32>
      %c0_15 = arith.constant 0 : index
      %c0_16 = arith.constant 0 : index
      %21 = vector.load %arg6[%c0_15, %c0_16] : memref<1x128xf32, #tpu.memory_space<vmem>>, vector<1x128xf32>
      %22 = vector.broadcast %21 : vector<1x128xf32> to vector<128x128xf32>
      %23 = arith.addf %20, %22 : vector<128x128xf32>
      %c0_17 = arith.constant 0 : index
      %c0_18 = arith.constant 0 : index
      %24 = vector.load %arg7[%c0_17, %c0_18] : memref<128x1xf32, #tpu.memory_space<vmem>>, vector<128x1xf32>
      %25 = vector.broadcast %24 : vector<128x1xf32> to vector<128x128xf32>
      %26 = arith.mulf %25, %17 : vector<128x128xf32>
      %27 = arith.addf %26, %23 : vector<128x128xf32>
      %c0_19 = arith.constant 0 : index
      %c0_20 = arith.constant 0 : index
      %28 = vector.load %arg8[%c0_19, %c0_20] : memref<128x128xf32, #tpu.memory_space<vmem>>, vector<128x128xf32>
      tpu.vector_store %arg8[%c0_19, %c0_20], %27 {strides = array<i32>} : memref<128x128xf32, #tpu.memory_space<vmem>>, vector<128x128xf32>,
    } else {
    }
    return
  }
  func.func @transform_0(%arg0: i32, %arg1: i32) -> (i32, i32) {
    %c0_i32 = arith.constant 0 : i32
    return %arg0, %arg1 : i32, i32
  }
  func.func @transform_1(%arg0: i32, %arg1: i32) -> (i32, i32) {
    %c0_i32 = arith.constant 0 : i32
    %c0_i32_0 = arith.constant 0 : i32
    %c0_i32_1 = arith.constant 0 : i32
    return %c0_i32, %c0_i32_0 : i32, i32
  }
  func.func @transform_2(%arg0: i32, %arg1: i32) -> (i32, i32) {
    %c0_i32 = arith.constant 0 : i32
    %c0_i32_0 = arith.constant 0 : i32
    return %arg0, %c0_i32 : i32, i32
  }
  func.func @transform_3(%arg0: i32, %arg1: i32) -> (i32, i32) {
    %c0_i32 = arith.constant 0 : i32
    %c0_i32_0 = arith.constant 0 : i32
    %c0_i32_1 = arith.constant 0 : i32
    return %c0_i32, %c0_i32_0 : i32, i32
  }
  func.func @transform_4(%arg0: i32, %arg1: i32) -> (i32, i32) {
    %c0_i32 = arith.constant 0 : i32
    %c0_i32_0 = arith.constant 0 : i32
    %c0_i32_1 = arith.constant 0 : i32
    return %c0_i32, %c0_i32_0 : i32, i32
  }
  func.func @transform_5(%arg0: i32, %arg1: i32) -> (i32, i32) {
    %c0_i32 = arith.constant 0 : i32
    %c0_i32_0 = arith.constant 0 : i32
    return %arg0, %c0_i32 : i32, i32
  }
  func.func @transform_6(%arg0: i32, %arg1: i32) -> (i32, i32) {
    %c0_i32 = arith.constant 0 : i32
    %c0_i32_0 = arith.constant 0 : i32
    return %arg0, %c0_i32 : i32, i32
  }
}

</mosaic_0001>

<bundles_post_ra>
// kernel: graphsage_forward.4
= control target key start
LH: loop header
LB: loop body
LE: loop exit
PB: predicated region body
PF: predicated region fallthrough
CT: control target
= control target key end

     0   :  { %s883_s9 = smov 0   ;;  %s980_s0 = inlined_call_operand.vmem [shape: bf16[256,256], index: 0, kind: input, shape index: {}]   ;;  %s981_s1 = inlined_call_operand.vmem [shape: bf16[256,128], index: 1, kind: input, shape index: {}]   ;;  %s982_s2 = inlined_call_operand.vmem [shape: bf16[256,128], index: 2, kind: output, shape index: {}]  }
   0x1 LB: > { %s608_s10 = sadd.s32 4294967295, %s866_s9   ;;  %p612_p0 = scmp.ge.s32.totalorder %s866_s9, 1  ;;  %s866_s9 = sphi %s883_s9, %s12_s9  }
   0x2   : > { %p114_p1 = scmp.lt.s32.totalorder %s866_s9, 3 }
   0x4   : > { %p115_p2 = pnand %p612_p0, %p114_p1 }
   0x5   : > { %v820_v0 = vld [vmem:[%s981_s1 + $0x40] sm:$0xff] (!%p115_p2)   ;;  %s613_s13 = sshll.u32 (!%p115_p2), %s608_s10, 4  ;;  %v822_v2 = vld [vmem:[%s981_s1 + $0x48] sm:$0xff] (!%p115_p2)   ;;  %v824_v4 = vld [vmem:[%s981_s1 + $0x50] sm:$0xff] (!%p115_p2)  }
   0x6   : > { %118 = sbr.rel (%p115_p2) target bundleno = 282 (0x11a), region = 28  ;;  %v821_v1 = vld [vmem:[%s981_s1] sm:$0xff] (!%p115_p2)   ;;  %732 = vmatprep.subr.bf16.mxu0 (!%p115_p2), %v820_v0  ;;  %796 = vmatprep.subr.bf16.mxu1 (!%p115_p2), %v820_v0  ;;  %v823_v3 = vld [vmem:[%s981_s1 + $0x8] sm:$0xff] (!%p115_p2)   ;;  %p138_p3 = scmp.lt.s32.totalorder (!%p115_p2), %s613_s13, 31  ;;  %v825_v5 = vld [vmem:[%s981_s1 + $0x10] sm:$0xff] (!%p115_p2)  }
   0x7   : > { %733 = vmatpush3.bf16.msra.mxu0 (!%p115_p2), %v821_v1  ;;  %804 = vmatpush3.bf16.msra.mxu1 (!%p115_p2), %v821_v1  ;;  %v826_v6 = vld [vmem:[%s981_s1 + $0x58] sm:$0xff] (!%p115_p2)   ;;  %v828_v8 = vld [vmem:[%s981_s1 + $0x60] sm:$0xff] (!%p115_p2)   ;;  %v830_v10 = vld [vmem:[%s981_s1 + $0x68] sm:$0xff] (!%p115_p2)  }
   0x8   : > { %734 = vmatprep.subr.bf16.mxu0 (!%p115_p2), %v822_v2  ;;  %797 = vmatprep.subr.bf16.mxu1 (!%p115_p2), %v822_v2  ;;  %v827_v7 = vld [vmem:[%s981_s1 + $0x18] sm:$0xff] (!%p115_p2)   ;;  %v829_v9 = vld [vmem:[%s981_s1 + $0x20] sm:$0xff] (!%p115_p2)   ;;  %v831_v13 = vld [vmem:[%s981_s1 + $0x28] sm:$0xff] (!%p115_p2)  }
   0x9   : > { %v832_v14 = vld [vmem:[%s981_s1 + $0x70] sm:$0xff] (!%p115_p2)   ;;  %v834_v16 = vld [vmem:[%s981_s1 + $0x78] sm:$0xff] (!%p115_p2)  }
   0xa   : > { %v833_v15 = vld [vmem:[%s981_s1 + $0x30] sm:$0xff] (!%p115_p2)   ;;  %v835_v17 = vld [vmem:[%s981_s1 + $0x38] sm:$0xff] (!%p115_p2)  }
   0xb   : > { %735 = vmatpush3.bf16.msra.mxu0 (!%p115_p2), %v823_v3  ;;  %805 = vmatpush3.bf16.msra.mxu1 (!%p115_p2), %v823_v3 }
   0xc   : > { %736 = vmatprep.subr.bf16.mxu0 (!%p115_p2), %v824_v4  ;;  %798 = vmatprep.subr.bf16.mxu1 (!%p115_p2), %v824_v4 }
   0xd   : > { %s984_s13 = smov (!%p138_p3, %s613_s13), 31 }
   0xe   : > { %s668_s28 = sshll.u32 %s984_s13, 3  ;;  %s617_s22 = sshll.u32 %s984_s13, 2 }
   0xf   : > { %737 = vmatpush3.bf16.msra.mxu0 %v825_v5  ;;  %806 = vmatpush3.bf16.msra.mxu1 %v825_v5  ;;  %s924_s5 = scalar_lea.vmem %s980_s0, %s668_s28  ;;  %s967_s25 = scalar_lea.vmem %s982_s2, %s617_s22 }
  0x10   : > { %738 = vmatprep.subr.bf16.mxu0 %v826_v6  ;;  %799 = vmatprep.subr.bf16.mxu1 %v826_v6  ;;  %v838_v11 = vld [vmem:[%s924_s5 + $0x4] ss:$8 sps:$4 sm:$0xff]   ;;  %v836_v18 = vld [vmem:[%s924_s5] ss:$8 sps:$4 sm:$0xff]   ;;  %v842_v20 = vld [vmem:[%s924_s5 + $0x14] ss:$8 sps:$4 sm:$0xff]  }
  0x11   : > { %v841_v12 = vld [vmem:[%s924_s5 + $0x44] ss:$8 sps:$4 sm:$0xff]   ;;  %407 = vmatprep.mubr.bf16.mxu0 %v838_v11  ;;  %v839_v19 = vld [vmem:[%s924_s5 + $0x40] ss:$8 sps:$4 sm:$0xff]   ;;  %v844_v21 = vld [vmem:[%s924_s5 + $0x54] ss:$8 sps:$4 sm:$0xff]  }
  0x12   : > { %439 = vmatprep.mubr.bf16.mxu1 %v841_v12  ;;  %v846_v22 = vld [vmem:[%s924_s5 + $0x10] ss:$8 sps:$4 sm:$0xff]   ;;  %v848_v24 = vld [vmem:[%s924_s5 + $0x24] ss:$8 sps:$4 sm:$0xff]   ;;  %v852_v26 = vld [vmem:[%s924_s5 + $0x20] ss:$8 sps:$4 sm:$0xff]  }
  0x13   : > { %739 = vmatpush3.bf16.msra.mxu0 %v827_v7  ;;  %807 = vmatpush3.bf16.msra.mxu1 %v827_v7  ;;  %v847_v23 = vld [vmem:[%s924_s5 + $0x50] ss:$8 sps:$4 sm:$0xff]   ;;  %v850_v25 = vld [vmem:[%s924_s5 + $0x64] ss:$8 sps:$4 sm:$0xff]   ;;  %v853_v27 = vld [vmem:[%s924_s5 + $0x60] ss:$8 sps:$4 sm:$0xff]  }
  0x14   : > { %740 = vmatprep.subr.bf16.mxu0 %v828_v8  ;;  %800 = vmatprep.subr.bf16.mxu1 %v828_v8  ;;  %v854_v28 = vld [vmem:[%s924_s5 + $0x34] ss:$8 sps:$4 sm:$0xff]   ;;  %v858_v30 = vld [vmem:[%s924_s5 + $0x30] ss:$8 sps:$4 sm:$0xff]  }
  0x15   : > { %v856_v29 = vld [vmem:[%s924_s5 + $0x74] ss:$8 sps:$4 sm:$0xff]   ;;  %v859_v31 = vld [vmem:[%s924_s5 + $0x70] ss:$8 sps:$4 sm:$0xff]  }
  0x17   : > { %741 = vmatpush3.bf16.msra.mxu0 %v829_v9  ;;  %808 = vmatpush3.bf16.msra.mxu1 %v829_v9 }
  0x18   : > { %742 = vmatprep.subr.bf16.mxu0 %v830_v10  ;;  %801 = vmatprep.subr.bf16.mxu1 %v830_v10 }
  0x1b   : > { %743 = vmatpush3.bf16.msra.mxu0 %v831_v13  ;;  %809 = vmatpush3.bf16.msra.mxu1 %v831_v13 }
  0x1c   : > { %744 = vmatprep.subr.bf16.mxu0 %v832_v14  ;;  %802 = vmatprep.subr.bf16.mxu1 %v832_v14 }
  0x1f   : > { %745 = vmatpush3.bf16.msra.mxu0 %v833_v15  ;;  %810 = vmatpush3.bf16.msra.mxu1 %v833_v15 }
  0x20   : > { %746 = vmatprep.subr.bf16.mxu0 %v834_v16  ;;  %803 = vmatprep.subr.bf16.mxu1 %v834_v16 }
  0x23   : > { %747 = vmatpush3.bf16.msra.mxu0 %v835_v17  ;;  %811 = vmatpush3.bf16.msra.mxu1 %v835_v17 }
  0x26   : > { %408 = vmatmul.mubr.bf16.vlgmr.msra.gmra.mrb[0].mxu0 %v836_v18  ;;  %440 = vmatmul.mubr.bf16.vlgmr.msra.gmra.mrb[0].mxu1 %v839_v19 }
  0x27   : > { %415 = vmatprep.mubr.bf16.mxu0 %v842_v20  ;;  %447 = vmatprep.mubr.bf16.mxu1 %v844_v21 }
  0x2e   : > { %416 = vmatmul.mubr.bf16.gmra.mrb[4].mxu0 %v846_v22  ;;  %448 = vmatmul.mubr.bf16.gmra.mrb[4].mxu1 %v847_v23 }
  0x2f   : > { %423 = vmatprep.mubr.bf16.mxu0 %v848_v24  ;;  %455 = vmatprep.mubr.bf16.mxu1 %v850_v25 }
  0x36   : > { %424 = vmatmul.mubr.bf16.gmra.mrb[8].mxu0 %v852_v26  ;;  %456 = vmatmul.mubr.bf16.gmra.mrb[8].mxu1 %v853_v27 }
  0x37   : > { %431 = vmatprep.mubr.bf16.mxu0 %v854_v28  ;;  %463 = vmatprep.mubr.bf16.mxu1 %v856_v29 }
  0x3e   : > { %432 = vmatmul.mubr.bf16.gmra.mrb[12].mxu0 %v858_v30  ;;  %464 = vmatmul.mubr.bf16.gmra.mrb[12].mxu1 %v859_v31 }
  0xf9   : > { %v748_v32 = vpop.f32.mrb[0].mxu0  ;;  %v772_v33 = vpop.f32.mrb[0].mxu1 }
  0xfa   : > { %v749_v34 = vpop.f32.mrb[1].mxu0  ;;  %v773_v35 = vpop.f32.mrb[1].mxu1 }
  0xfb   : > { %v750_v36 = vadd.f32 %v749_v34, %v748_v32  ;;  %v774_v37 = vadd.f32 %v773_v35, %v772_v33  ;;  %v751_v38 = vpop.f32.mrb[2].mxu0  ;;  %v775_v39 = vpop.f32.mrb[2].mxu1 }
  0xfc   : > { %v752_v40 = vpop.f32.mrb[3].mxu0  ;;  %v776_v41 = vpop.f32.mrb[3].mxu1 }
  0xfd   : > { %v753_v42 = vadd.f32 %v752_v40, %v751_v38  ;;  %v777_v43 = vadd.f32 %v776_v41, %v775_v39 }
  0xff   : > { %v688_v44 = vpack.c.bf16 %v753_v42, %v750_v36  ;;  %v708_v45 = vpack.c.bf16 %v777_v43, %v774_v37 }
 0x101   : > { %689 = vst [vmem:[%s967_s25] sm:$0xff] %v688_v44   ;;  %728 = vst [vmem:[%s967_s25 + $0x20] sm:$0xff] %v708_v45   ;;  %v754_v46 = vpop.f32.mrb[4].mxu0  ;;  %v778_v47 = vpop.f32.mrb[4].mxu1 }
 0x102   : > { %v755_v48 = vpop.f32.mrb[5].mxu0  ;;  %v779_v49 = vpop.f32.mrb[5].mxu1 }
 0x103   : > { %v756_v50 = vadd.f32 %v755_v48, %v754_v46  ;;  %v780_v51 = vadd.f32 %v779_v49, %v778_v47  ;;  %v757_v52 = vpop.f32.mrb[6].mxu0  ;;  %v781_v53 = vpop.f32.mrb[6].mxu1 }
 0x104   : > { %v758_v54 = vpop.f32.mrb[7].mxu0  ;;  %v782_v55 = vpop.f32.mrb[7].mxu1 }
 0x105   : > { %v759_v56 = vadd.f32 %v758_v54, %v757_v52  ;;  %v783_v57 = vadd.f32 %v782_v55, %v781_v53 }
 0x107   : > { %v693_v58 = vpack.c.bf16 %v759_v56, %v756_v50  ;;  %v713_v59 = vpack.c.bf16 %v783_v57, %v780_v51 }
 0x109   : > { %725 = vst [vmem:[%s967_s25 + $0x8] sm:$0xff] %v693_v58   ;;  %729 = vst [vmem:[%s967_s25 + $0x28] sm:$0xff] %v713_v59   ;;  %v760_v60 = vpop.f32.mrb[8].mxu0  ;;  %v784_v61 = vpop.f32.mrb[8].mxu1 }
 0x10a   : > { %v761_v62 = vpop.f32.mrb[9].mxu0  ;;  %v785_v63 = vpop.f32.mrb[9].mxu1 }
 0x10b   : > { %v762_v0 = vadd.f32 %v761_v62, %v760_v60  ;;  %v786_v1 = vadd.f32 %v785_v63, %v784_v61  ;;  %v763_v2 = vpop.f32.mrb[10].mxu0  ;;  %v787_v3 = vpop.f32.mrb[10].mxu1 }
 0x10c   : > { %v764_v4 = vpop.f32.mrb[11].mxu0  ;;  %v788_v5 = vpop.f32.mrb[11].mxu1 }
 0x10d   : > { %v765_v6 = vadd.f32 %v764_v4, %v763_v2  ;;  %v789_v7 = vadd.f32 %v788_v5, %v787_v3 }
 0x10f   : > { %v698_v8 = vpack.c.bf16 %v765_v6, %v762_v0  ;;  %v718_v9 = vpack.c.bf16 %v789_v7, %v786_v1 }
 0x111   : > { %726 = vst [vmem:[%s967_s25 + $0x10] sm:$0xff] %v698_v8   ;;  %730 = vst [vmem:[%s967_s25 + $0x30] sm:$0xff] %v718_v9   ;;  %v766_v10 = vpop.f32.mrb[12].mxu0  ;;  %v790_v11 = vpop.f32.mrb[12].mxu1 }
 0x112   : > { %v767_v12 = vpop.f32.mrb[13].mxu0  ;;  %v791_v13 = vpop.f32.mrb[13].mxu1 }
 0x113   : > { %v768_v14 = vadd.f32 %v767_v12, %v766_v10  ;;  %v792_v15 = vadd.f32 %v791_v13, %v790_v11  ;;  %v769_v16 = vpop.f32.mrb[14].mxu0  ;;  %v793_v17 = vpop.f32.mrb[14].mxu1 }
 0x114   : > { %v770_v18 = vpop.f32.mrb[15].mxu0  ;;  %v794_v19 = vpop.f32.mrb[15].mxu1 }
 0x115   : > { %v771_v20 = vadd.f32 %v770_v18, %v769_v16  ;;  %v795_v21 = vadd.f32 %v794_v19, %v793_v17 }
 0x117   : > { %v703_v22 = vpack.c.bf16 %v771_v20, %v768_v14  ;;  %v723_v23 = vpack.c.bf16 %v795_v21, %v792_v15 }
 0x119   : > { %727 = vst [vmem:[%s967_s25 + $0x18] sm:$0xff] %v703_v22   ;;  %731 = vst [vmem:[%s967_s25 + $0x38] sm:$0xff] %v723_v23  }
 0x11a PF: > { %s12_s9 = sadd.s32 1, %s866_s9  }
 0x11b   : > { %p9_p4 = scmp.ge.s32.totalorder %s12_s9, 4  }
 0x11d   :  { %11 = sbr.rel (!%p9_p4) target bundleno = 1 (0x1), region = 58 }

// kernel: graphsage_forward.3
= control target key start
LH: loop header
LB: loop body
LE: loop exit
PB: predicated region body
PF: predicated region fallthrough
CT: control target
= control target key end

     0   :  { %s1958_s24 = smov 0   ;;  %s1960_s25 = smov 0   ;;  %s2273_s0 = inlined_call_operand.vmem [shape: s8[256,256], index: 0, kind: input, shape index: {}]   ;;  %s2274_s1 = inlined_call_operand.vmem [shape: bf16[256,128], index: 1, kind: input, shape index: {}, may-alias: {1,2}]   ;;  %s2275_s2 = inlined_call_operand.vmem [shape: bf16[256,128], index: 2, kind: input, shape index: {}, may-alias: {1,2}]   ;;  %s2276_s3 = inlined_call_operand.vmem [shape: bf16[128,256], index: 3, kind: input, shape index: {}]   ;;  %s2277_s4 = inlined_call_operand.vmem [shape: bf16[128,256], index: 4, kind: input, shape index: {}]   ;;  %s2278_s5 = inlined_call_operand.vmem [shape: f32[1,256], index: 5, kind: input, shape index: {}]   ;;  %s2279_s6 = inlined_call_operand.vmem [shape: f32[256,1], index: 6, kind: input, shape index: {}]   ;;  %s2280_s7 = inlined_call_operand.vmem [shape: bf16[256,256], index: 7, kind: output, shape index: {}]  }
   0x1   :  { %s1962_s26 = smov 0   ;;  %s1964_s27 = smov 0  }
   0x2   :  { %s1966_s28 = smov 0   ;;  %s1968_s29 = smov 0  }
   0x3   :  { %s1970_s30 = smov 0  }
   0x4 LB: > { %s26_s8 = sadd.s32 1, %s1906_s28  ;;  %s29_s9 = sadd.s32 1, %s1910_s29  ;;  %s1914_s30 = sphi %s1970_s30, %s17_s30   ;;  %s1910_s29 = sphi %s1968_s29, %s2286_s29   ;;  %s1906_s28 = sphi %s1966_s28, %s2285_s28   ;;  %s1902_s27 = sphi %s1964_s27, %s2284_s27   ;;  %s1898_s26 = sphi %s1962_s26, %s2283_s26   ;;  %s1894_s25 = sphi %s1960_s25, %s2282_s25   ;;  %s1890_s24 = sphi %s1958_s24, %s2281_s24  }
   0x5   : > { %p27_p0 = scmp.ge.s32.totalorder %s26_s8, 2  ;;  %p45_p1 = scmp.ne.s32.totalorder %s1894_s25, %s1890_s24 }
   0x6   : > { %p46_p2 = scmp.eq.s32.totalorder %s1914_s30, 0  ;;  %s38_s13 = sadd.s32 1, %s1894_s25 }
   0x7   : > { %s2288_s8 = smov (%p27_p0, %s26_s8), 0  ;;  %s2290_s9 = smov (!%p27_p0, %s29_s9), %s1910_s29 }
   0x8   : > { %p47_p3 = por %p46_p2, %p45_p1  ;;  %p31_p4 = scmp.ge.s32.totalorder %s2290_s9, 2 }
   0x9   : > { %s34_s10 = ssub.s32 %s1906_s28, %s2288_s8  ;;  %p1570_p6 = scmp.ge.s32.totalorder %s1914_s30, 4 }
   0xa   : > { %s2292_s9 = smov (%p31_p4, %s2290_s9), 0 }
   0xb   : > { %s33_s11 = ssub.s32 %s1910_s29, %s2292_s9  ;;  %245 = sbr.rel (%p1570_p6) target bundleno = 26 (0x1a), region = 32 }
   0xc   : > { %s35_s12 = sor.u32 %s34_s10, %s33_s11 }
   0xd   : > { %p36_p5 = scmp.eq.s32.totalorder %s35_s12, 0 }
   0xf   : > { %s2009_s14 = scalar_select %p36_p5, %s1894_s25, %s38_s13  }
  0x12   : > { %248 = sbr.rel (!%p47_p3) target bundleno = 26 (0x1a), region = 36  ;;  %s250_s15 = sand.u32 (%p47_p3), 1, %s1894_s25  }
  0x13   : > { %s1654_s16 = sshll.u32 (%p47_p3), %s1910_s29, 3  ;;  %s1571_s17 = sshll.u32 (%p47_p3), %s250_s15, 5 }
  0x14   : > { %s255_s18 = sadd.s32 (%p47_p3), %s1906_s28, %s1654_s16  ;;  %s252_s23 = scalar_lea.vmem (%p47_p3), [#allocation3], %s1571_s17 }
  0x15   : > { %s1574_s19 = sshll.u32 (%p47_p3), %s255_s18, 3 }
  0x16   : > { %s257_s22 = scalar_lea.vmem (%p47_p3), %s2273_s0, %s1574_s19 }
  0x17   : > { %v291_v0 = vld [vmem:[%s257_s22] sm:$0xff] (%p47_p3)  ;;  %v293_v1 = vld [vmem:[%s257_s22 + $0x10] sm:$0xff] (%p47_p3) }
  0x18   : > { %v295_v2 = vld [vmem:[%s257_s22 + $0x20] sm:$0xff] (%p47_p3)  ;;  %292 = vst [vmem:[%s252_s23] sm:$0xff] (%p47_p3), %v291_v0  ;;  %294 = vst [vmem:[%s252_s23 + $0x8] sm:$0xff] (%p47_p3), %v293_v1  ;;  %v297_v3 = vld [vmem:[%s257_s22 + $0x30] sm:$0xff] (%p47_p3) }
  0x19   : > { %296 = vst [vmem:[%s252_s23 + $0x10] sm:$0xff] %v295_v2  ;;  %298 = vst [vmem:[%s252_s23 + $0x18] sm:$0xff] %v297_v3 }
  0x1a PF: > { %p1575_p7 = scmp.ge.s32.totalorder %s1914_s30, 1  ;;  %p321_p8 = scmp.lt.s32.totalorder %s1914_s30, 5 }
  0x1c   : > { %p322_p9 = pnand %p1575_p7, %p321_p8 }
  0x1d   : > { %s328_s10 = sand.u32 (!%p322_p9), 1, %s1890_s24   ;;  %s1577_s11 = sshll.u32 (!%p322_p9), %s1902_s27, 4 }
  0x1e   : > { %325 = sbr.rel (%p322_p9) target bundleno = 596 (0x254), region = 82  ;;  %s1576_s12 = sshll.u32 (!%p322_p9), %s328_s10, 5 }
  0x1f   : > { %p372_p10 = scmp.lt.s32.totalorder (!%p322_p9), %s1577_s11, 31  ;;  %s2037_s27 = scalar_lea.vmem (!%p322_p9), [#allocation3], %s1576_s12 }
  0x20   : > { %p1584_p11 = scmp.ne.s32.totalorder (!%p322_p9), %s1898_s26, 0 }
  0x25   : > { %s2294_s11 = smov (!%p372_p10, %s1577_s11), 31  ;;  %394 = sbr.rel (%p1584_p11) target bundleno = 47 (0x2f), region = 90 }
  0x26   : > { %s1578_s13 = sshll.u32 %s2294_s11, 2  ;;  %s1580_s15 = sshll.u32 %s2294_s11, 3  ;;  %v1916_v4 = vmov (!%p1584_p11), 0.0  }
  0x27   : > { %s2025_s18 = scalar_lea.vmem %s2275_s2, %s1578_s13  ;;  %s2030_s21 = scalar_lea.vmem %s2279_s6, %s1580_s15  ;;  %395 = vst [vmem:[#allocation2] sm:$0xff] (!%p1584_p11), %v1916_v4  ;;  %396 = vst [vmem:[#allocation2 + $0x8] sm:$0xff] (!%p1584_p11), %v1916_v4 }
  0x28   : > { %s2035_s24 = scalar_lea.vmem %s2280_s7, %s1580_s15  ;;  %397 = vst [vmem:[#allocation2 + $0x10] sm:$0xff] (!%p1584_p11), %v1916_v4  ;;  %398 = vst [vmem:[#allocation2 + $0x18] sm:$0xff] (!%p1584_p11), %v1916_v4 }
  0x29   : > { %399 = vst [vmem:[#allocation2 + $0x20] sm:$0xff] (!%p1584_p11), %v1916_v4  ;;  %400 = vst [vmem:[#allocation2 + $0x28] sm:$0xff] (!%p1584_p11), %v1916_v4 }
  0x2a   : > { %401 = vst [vmem:[#allocation2 + $0x30] sm:$0xff] (!%p1584_p11), %v1916_v4  ;;  %402 = vst [vmem:[#allocation2 + $0x38] sm:$0xff] (!%p1584_p11), %v1916_v4 }
  0x2b   : > { %403 = vst [vmem:[#allocation2 + $0x40] sm:$0xff] (!%p1584_p11), %v1916_v4  ;;  %404 = vst [vmem:[#allocation2 + $0x48] sm:$0xff] (!%p1584_p11), %v1916_v4 }
  0x2c   : > { %405 = vst [vmem:[#allocation2 + $0x50] sm:$0xff] %v1916_v4  ;;  %406 = vst [vmem:[#allocation2 + $0x58] sm:$0xff] %v1916_v4 }
  0x2d   : > { %407 = vst [vmem:[#allocation2 + $0x60] sm:$0xff] %v1916_v4  ;;  %408 = vst [vmem:[#allocation2 + $0x68] sm:$0xff] %v1916_v4 }
  0x2e   : > { %409 = vst [vmem:[#allocation2 + $0x70] sm:$0xff] %v1916_v4  ;;  %410 = vst [vmem:[#allocation2 + $0x78] sm:$0xff] %v1916_v4 }
  0x2f PF: > { %s1585_s10 = sshll.u32 %s1898_s26, 7  ;;  %v432_v5 = vld [vmem:[%s2037_s27] sm:$0xff]  ;;  %v434_v6 = vld [vmem:[%s2037_s27 + $0x10] sm:$0xff]  ;;  %v433_v17 = vld [vmem:[%s2037_s27 + $0x8] sm:$0xff]  ;;  %p1595_p12 = scmp.ne.s32.totalorder %s1898_s26, 1 }
  0x30   : > { %s412_s11 = sshra.s32 %s1585_s10, 3  ;;  %v436_v7 = vunpack.c.l.s8.bf16 %v432_v5  ;;  %v440_v8 = vunpack.c.l.s8.bf16 %v434_v6  ;;  %v435_v18 = vld [vmem:[%s2037_s27 + $0x18] sm:$0xff]  ;;  %v437_v19 = vunpack.c.h.s8.bf16 %v432_v5  ;;  %v441_v20 = vunpack.c.h.s8.bf16 %v434_v6 }
  0x31   : > { %s1586_s12 = sshll.u32 %s412_s11, 2  ;;  %v438_v21 = vunpack.c.l.s8.bf16 %v433_v17  ;;  %v442_v22 = vunpack.c.l.s8.bf16 %v435_v18  ;;  %v439_v23 = vunpack.c.h.s8.bf16 %v433_v17  ;;  %v443_v24 = vunpack.c.h.s8.bf16 %v435_v18  ;;  %v444_v27 = vld [vmem:[#allocation2] sm:$0xff]  ;;  %v445_v37 = vld [vmem:[#allocation2 + $0x8] sm:$0xff]  ;;  %v1815_v17 = vld [vmem:[%s2277_s4 + $0x10] ss:$8 sps:$4 sm:$0xff] (!%p1595_p12)  }
  0x32   : > { %s2046_s16 = scalar_lea.vmem %s2274_s1, %s1586_s12  ;;  %1704 = vmatprep.mubr.bf16.mxu0 %v436_v7  ;;  %1712 = vmatprep.mubr.bf16.mxu1 %v440_v8  ;;  %v446_v25 = vld [vmem:[#allocation2 + $0x10] sm:$0xff]  ;;  %v447_v31 = vld [vmem:[#allocation2 + $0x18] sm:$0xff]  ;;  %v1816_v18 = vld [vmem:[%s2276_s3 + $0x24] ss:$8 sps:$4 sm:$0xff] (!%p1595_p12)  }
  0x33   : > { %v1794_v9 = vld [vmem:[%s2046_s16] sm:$0xff]   ;;  %v1795_v10 = vld [vmem:[%s2046_s16 + $0x8] sm:$0xff]   ;;  %v1796_v11 = vld [vmem:[%s2046_s16 + $0x10] sm:$0xff]  }
  0x34   : > { %1688 = vmatprep.subr.bf16.mxu0 %v1794_v9  ;;  %1720 = vmatprep.subr.bf16.mxu1 %v1794_v9  ;;  %v1797_v12 = vld [vmem:[%s2046_s16 + $0x18] sm:$0xff]   ;;  %v1798_v13 = vld [vmem:[%s2046_s16 + $0x20] sm:$0xff]   ;;  %v1799_v14 = vld [vmem:[%s2046_s16 + $0x28] sm:$0xff]  }
  0x35   : > { %1689 = vmatpush3.bf16.msra.mxu0 %v1794_v9  ;;  %1728 = vmatpush3.bf16.msra.mxu1 %v1794_v9  ;;  %v1800_v15 = vld [vmem:[%s2046_s16 + $0x30] sm:$0xff]   ;;  %v1801_v16 = vld [vmem:[%s2046_s16 + $0x38] sm:$0xff]   ;;  %v452_v28 = vld [vmem:[#allocation2 + $0x40] sm:$0xff] }
  0x36   : > { %1690 = vmatprep.subr.bf16.mxu0 %v1795_v10  ;;  %1721 = vmatprep.subr.bf16.mxu1 %v1795_v10  ;;  %v454_v26 = vld [vmem:[#allocation2 + $0x50] sm:$0xff]  ;;  %v455_v32 = vld [vmem:[#allocation2 + $0x58] sm:$0xff]  ;;  %v453_v38 = vld [vmem:[#allocation2 + $0x48] sm:$0xff] }
  0x37   : > { %v450_v49 = vld [vmem:[#allocation2 + $0x30] sm:$0xff]  ;;  %v448_v51 = vld [vmem:[#allocation2 + $0x20] sm:$0xff]  ;;  %v451_v55 = vld [vmem:[#allocation2 + $0x38] sm:$0xff] }
  0x38   : > { %v458_v50 = vld [vmem:[#allocation2 + $0x70] sm:$0xff]  ;;  %v456_v52 = vld [vmem:[#allocation2 + $0x60] sm:$0xff]  ;;  %v459_v56 = vld [vmem:[#allocation2 + $0x78] sm:$0xff] }
  0x39   : > { %1691 = vmatpush3.bf16.msra.mxu0 %v1795_v10  ;;  %1729 = vmatpush3.bf16.msra.mxu1 %v1795_v10  ;;  %v449_v61 = vld [vmem:[#allocation2 + $0x28] sm:$0xff] }
  0x3a   : > { %1692 = vmatprep.subr.bf16.mxu0 %v1796_v11  ;;  %1722 = vmatprep.subr.bf16.mxu1 %v1796_v11  ;;  %v457_v62 = vld [vmem:[#allocation2 + $0x68] sm:$0xff] }
  0x3b   : > { %v1804_v9 = vld [vmem:[%s2276_s3 + $0x4] ss:$8 sps:$4 sm:$0xff] (!%p1595_p12)  }
  0x3c   : > { %v1806_v10 = vld [vmem:[%s2277_s4 + $0x4] ss:$8 sps:$4 sm:$0xff] (!%p1595_p12)  }
  0x3d   : > { %1693 = vmatpush3.bf16.msra.mxu0 %v1796_v11  ;;  %1730 = vmatpush3.bf16.msra.mxu1 %v1796_v11  ;;  %v1917_v11 = vmov (!%p1595_p12), 0  }
  0x3e   : > { %1694 = vmatprep.subr.bf16.mxu0 %v1797_v12  ;;  %1723 = vmatprep.subr.bf16.mxu1 %v1797_v12 }
  0x3f   : > { %1802 = vset.pattern.permute.xlu0 (!%p1595_p12), %v1917_v11  ;;  %1803 = vset.pattern.permute.xlu1 (!%p1595_p12), %v1917_v11 }
  0x41   : > { %1695 = vmatpush3.bf16.msra.mxu0 %v1797_v12  ;;  %1731 = vmatpush3.bf16.msra.mxu1 %v1797_v12  ;;  %v1808_v12 = vld [vmem:[%s2276_s3] ss:$8 sps:$4 sm:$0xff] (!%p1595_p12)  }
  0x42   : > { %1696 = vmatprep.subr.bf16.mxu0 %v1798_v13  ;;  %1724 = vmatprep.subr.bf16.mxu1 %v1798_v13 }
  0x45   : > { %1697 = vmatpush3.bf16.msra.mxu0 %v1798_v13  ;;  %1732 = vmatpush3.bf16.msra.mxu1 %v1798_v13  ;;  %v1809_v13 = vld [vmem:[%s2277_s4] ss:$8 sps:$4 sm:$0xff] (!%p1595_p12)  }
  0x46   : > { %1698 = vmatprep.subr.bf16.mxu0 %v1799_v14  ;;  %1725 = vmatprep.subr.bf16.mxu1 %v1799_v14 }
  0x49   : > { %1699 = vmatpush3.bf16.msra.mxu0 %v1799_v14  ;;  %1733 = vmatpush3.bf16.msra.mxu1 %v1799_v14  ;;  %v1810_v14 = vld [vmem:[%s2276_s3 + $0x14] ss:$8 sps:$4 sm:$0xff] (!%p1595_p12)  }
  0x4a   : > { %1700 = vmatprep.subr.bf16.mxu0 %v1800_v15  ;;  %1726 = vmatprep.subr.bf16.mxu1 %v1800_v15 }
  0x4d   : > { %1701 = vmatpush3.bf16.msra.mxu0 %v1800_v15  ;;  %1734 = vmatpush3.bf16.msra.mxu1 %v1800_v15  ;;  %v1812_v15 = vld [vmem:[%s2277_s4 + $0x14] ss:$8 sps:$4 sm:$0xff] (!%p1595_p12)  }
  0x4e   : > { %1702 = vmatprep.subr.bf16.mxu0 %v1801_v16  ;;  %1727 = vmatprep.subr.bf16.mxu1 %v1801_v16 }
  0x51   : > { %1703 = vmatpush3.bf16.msra.mxu0 %v1801_v16  ;;  %1735 = vmatpush3.bf16.msra.mxu1 %v1801_v16  ;;  %v1814_v16 = vld [vmem:[%s2276_s3 + $0x10] ss:$8 sps:$4 sm:$0xff] (!%p1595_p12)  }
  0x52   : > { %761 = vmatprep.subr.bf16.mxu0 (!%p1595_p12), %v1804_v9  ;;  %1046 = vmatprep.subr.bf16.mxu1 (!%p1595_p12), %v1806_v10  ;;  %v1174_v10 = vld [vmem:[%s2030_s21 + $0x78] sm:$0xff] (!%p1595_p12) }
  0x54   : > { %1705 = vmatmul.mubr.bf16.vlgmr.msra.gmra.mrb[0].mxu0 %v437_v19  ;;  %1713 = vmatmul.mubr.bf16.vlgmr.msra.gmra.mrb[0].mxu1 %v441_v20  ;;  %v1818_v19 = vld [vmem:[%s2277_s4 + $0x24] ss:$8 sps:$4 sm:$0xff] (!%p1595_p12)   ;;  %v1820_v20 = vld [vmem:[%s2276_s3 + $0x20] ss:$8 sps:$4 sm:$0xff] (!%p1595_p12)  }
  0x55   : > { %1708 = vmatprep.mubr.bf16.mxu0 %v438_v21  ;;  %1716 = vmatprep.mubr.bf16.mxu1 %v442_v22  ;;  %v1821_v21 = vld [vmem:[%s2277_s4 + $0x20] ss:$8 sps:$4 sm:$0xff] (!%p1595_p12)   ;;  %v1822_v22 = vld [vmem:[%s2276_s3 + $0x34] ss:$8 sps:$4 sm:$0xff] (!%p1595_p12)  }
  0x56   : > { %762 = vmatpush1.bf16.msra.mxu0 (!%p1595_p12), %v1808_v12  ;;  %1047 = vmatpush1.bf16.msra.mxu1 (!%p1595_p12), %v1809_v13  ;;  %v1173_v12 = vld [vmem:[%s2030_s21 + $0x70] sm:$0xff] (!%p1595_p12) }
  0x57   : > { %763 = vmatprep.subr.bf16.mxu0 (!%p1595_p12), %v1810_v14  ;;  %1048 = vmatprep.subr.bf16.mxu1 (!%p1595_p12), %v1812_v15  ;;  %v1856_v14 = vld [vmem:[%s2025_s18 + $0x20] sm:$0xff] (!%p1595_p12)  }
  0x5a   : > { %764 = vmatpush1.bf16.msra.mxu0 (!%p1595_p12), %v1814_v16  ;;  %1049 = vmatpush1.bf16.msra.mxu1 (!%p1595_p12), %v1815_v17 }
  0x5b   : > { %765 = vmatprep.subr.bf16.mxu0 (!%p1595_p12), %v1816_v18  ;;  %1050 = vmatprep.subr.bf16.mxu1 (!%p1595_p12), %v1818_v19  ;;  %v1857_v18 = vld [vmem:[%s2025_s18 + $0x28] sm:$0xff] (!%p1595_p12)  }
  0x5c   : > { %1709 = vmatmul.mubr.bf16.gmra.mrb[4].mxu0 %v439_v23  ;;  %1717 = vmatmul.mubr.bf16.gmra.mrb[4].mxu1 %v443_v24  ;;  %v1824_v23 = vld [vmem:[%s2277_s4 + $0x34] ss:$8 sps:$4 sm:$0xff] (!%p1595_p12)   ;;  %v1826_v24 = vld [vmem:[%s2276_s3 + $0x30] ss:$8 sps:$4 sm:$0xff] (!%p1595_p12)  }
  0x5d   : > { %793 = vmatprep.mubr.bf16.mxu0 (!%p1595_p12), %v1917_v11  ;;  %1078 = vmatprep.mubr.bf16.mxu1 (!%p1595_p12), %v1917_v11 }
  0x5e   : > { %766 = vmatpush1.bf16.msra.mxu0 (!%p1595_p12), %v1820_v20  ;;  %1051 = vmatpush1.bf16.msra.mxu1 (!%p1595_p12), %v1821_v21 }
  0x5f   : > { %767 = vmatprep.subr.bf16.mxu0 (!%p1595_p12), %v1822_v22  ;;  %1052 = vmatprep.subr.bf16.mxu1 (!%p1595_p12), %v1824_v23  ;;  %v1858_v22 = vld [vmem:[%s2025_s18 + $0x30] sm:$0xff] (!%p1595_p12)  }
  0x62   : > { %768 = vmatpush1.bf16.msra.mxu0 (!%p1595_p12), %v1826_v24 }
 0x127   : > { %v1706_v29 = vpop.f32.mrb[0].mxu0  ;;  %v1714_v30 = vpop.f32.mrb[0].mxu1 }
 0x128   : > { %v607_v33 = vadd.f32 %v1706_v29, %v446_v25  ;;  %v615_v34 = vadd.f32 %v1714_v30, %v454_v26  ;;  %v542_v35 = vpop.f32.mrb[1].mxu0  ;;  %v574_v36 = vpop.f32.mrb[1].mxu1  ;;  %v1827_v25 = vld [vmem:[%s2277_s4 + $0x30] ss:$8 sps:$4 sm:$0xff] (!%p1595_p12)   ;;  %v1828_v26 = vld [vmem:[%s2276_s3 + $0x44] ss:$8 sps:$4 sm:$0xff] (!%p1595_p12)  }
 0x129   : > { %v605_v39 = vadd.f32 %v542_v35, %v444_v27  ;;  %v613_v40 = vadd.f32 %v574_v36, %v452_v28  ;;  %v1707_v41 = vpop.f32.mrb[2].mxu0  ;;  %v1715_v42 = vpop.f32.mrb[2].mxu1  ;;  %v1830_v27 = vld [vmem:[%s2277_s4 + $0x44] ss:$8 sps:$4 sm:$0xff] (!%p1595_p12)   ;;  %v1832_v28 = vld [vmem:[%s2276_s3 + $0x40] ss:$8 sps:$4 sm:$0xff] (!%p1595_p12)   ;;  %1053 = vmatpush1.bf16.msra.mxu1 (!%p1595_p12), %v1827_v25  ;;  %769 = vmatprep.subr.bf16.mxu0 (!%p1595_p12), %v1828_v26 }
 0x12a   : > { %623 = vst [vmem:[#allocation2 + $0x10] sm:$0xff] %v607_v33  ;;  %631 = vst [vmem:[#allocation2 + $0x50] sm:$0xff] %v615_v34  ;;  %v608_v43 = vadd.f32 %v1707_v41, %v447_v31  ;;  %v616_v44 = vadd.f32 %v1715_v42, %v455_v32  ;;  %v545_v45 = vpop.f32.mrb[3].mxu0  ;;  %v577_v46 = vpop.f32.mrb[3].mxu1  ;;  %v1833_v29 = vld [vmem:[%s2277_s4 + $0x40] ss:$8 sps:$4 sm:$0xff] (!%p1595_p12)   ;;  %1054 = vmatprep.subr.bf16.mxu1 (!%p1595_p12), %v1830_v27  ;;  %770 = vmatpush1.bf16.msra.mxu0 (!%p1595_p12), %v1832_v28  ;;  %v908_v27 = vlaneseq (!%p1595_p12) }
 0x12b   : > { %621 = vst [vmem:[#allocation2] sm:$0xff] %v605_v39  ;;  %629 = vst [vmem:[#allocation2 + $0x40] sm:$0xff] %v613_v40  ;;  %v606_v47 = vadd.f32 %v545_v45, %v445_v37  ;;  %v614_v48 = vadd.f32 %v577_v46, %v453_v38  ;;  %v1834_v30 = vld [vmem:[%s2276_s3 + $0x54] ss:$8 sps:$4 sm:$0xff] (!%p1595_p12)   ;;  %v1838_v32 = vld [vmem:[%s2276_s3 + $0x50] ss:$8 sps:$4 sm:$0xff] (!%p1595_p12)  }
 0x12c   : > { %624 = vst [vmem:[#allocation2 + $0x18] sm:$0xff] %v608_v43  ;;  %632 = vst [vmem:[#allocation2 + $0x58] sm:$0xff] %v616_v44  ;;  %v1836_v31 = vld [vmem:[%s2277_s4 + $0x54] ss:$8 sps:$4 sm:$0xff] (!%p1595_p12)   ;;  %v1839_v33 = vld [vmem:[%s2277_s4 + $0x50] ss:$8 sps:$4 sm:$0xff] (!%p1595_p12)   ;;  %771 = vmatprep.subr.bf16.mxu0 (!%p1595_p12), %v1834_v30 }
 0x12d   : > { %622 = vst [vmem:[#allocation2 + $0x8] sm:$0xff] %v606_v47  ;;  %630 = vst [vmem:[#allocation2 + $0x48] sm:$0xff] %v614_v48  ;;  %1055 = vmatpush1.bf16.msra.mxu1 (!%p1595_p12), %v1833_v29  ;;  %v1840_v34 = vld [vmem:[%s2276_s3 + $0x64] ss:$8 sps:$4 sm:$0xff] (!%p1595_p12)   ;;  %v1844_v36 = vld [vmem:[%s2276_s3 + $0x60] ss:$8 sps:$4 sm:$0xff] (!%p1595_p12)  }
 0x12e   : > { %1056 = vmatprep.subr.bf16.mxu1 (!%p1595_p12), %v1836_v31  ;;  %v1842_v35 = vld [vmem:[%s2277_s4 + $0x64] ss:$8 sps:$4 sm:$0xff] (!%p1595_p12)   ;;  %772 = vmatpush1.bf16.msra.mxu0 (!%p1595_p12), %v1838_v32  ;;  %v1845_v37 = vld [vmem:[%s2277_s4 + $0x60] ss:$8 sps:$4 sm:$0xff] (!%p1595_p12)   ;;  %v1846_v38 = vld [vmem:[%s2276_s3 + $0x74] ss:$8 sps:$4 sm:$0xff] (!%p1595_p12)  }
 0x12f   : > { %v1710_v53 = vpop.f32.mrb[4].mxu0  ;;  %v1718_v54 = vpop.f32.mrb[4].mxu1  ;;  %640 = sbr.rel (%p1595_p12) target bundleno = 596 (0x254), region = 94  ;;  %773 = vmatprep.subr.bf16.mxu0 (!%p1595_p12), %v1840_v34  ;;  %v1848_v39 = vld [vmem:[%s2277_s4 + $0x74] ss:$8 sps:$4 sm:$0xff] (!%p1595_p12)   ;;  %v1852_v45 = vld [vmem:[%s2025_s18] sm:$0xff] (!%p1595_p12)  }
 0x130   : > { %v611_v57 = vadd.f32 %v1710_v53, %v450_v49  ;;  %v619_v58 = vadd.f32 %v1718_v54, %v458_v50  ;;  %v558_v59 = vpop.f32.mrb[5].mxu0  ;;  %v590_v60 = vpop.f32.mrb[5].mxu1  ;;  %v1850_v40 = vld [vmem:[%s2276_s3 + $0x70] ss:$8 sps:$4 sm:$0xff] (!%p1595_p12)   ;;  %v1159_v46 = vld [vmem:[%s2030_s21] sm:$0xff] (!%p1595_p12)  ;;  %v1160_v50 = vld [vmem:[%s2030_s21 + $0x8] sm:$0xff] (!%p1595_p12) }
 0x131   : > { %v609_v63 = vadd.f32 %v558_v59, %v448_v51  ;;  %v617_v0 = vadd.f32 %v590_v60, %v456_v52  ;;  %v1711_v1 = vpop.f32.mrb[6].mxu0  ;;  %v1719_v2 = vpop.f32.mrb[6].mxu1  ;;  %1057 = vmatpush1.bf16.msra.mxu1 (!%p1595_p12), %v1839_v33  ;;  %v1851_v41 = vld [vmem:[%s2277_s4 + $0x70] ss:$8 sps:$4 sm:$0xff] (!%p1595_p12)   ;;  %1177 = vperm.xlu0 (!%p1595_p12), %1802, %v1159_v46   ;;  %v1853_v53 = vld [vmem:[%s2025_s18 + $0x8] sm:$0xff] (!%p1595_p12)   ;;  %v909_v28 = vshrl.u32 (!%p1595_p12), %v908_v27, 7 }
 0x132   : > { %627 = vst [vmem:[#allocation2 + $0x30] sm:$0xff] %v611_v57  ;;  %635 = vst [vmem:[#allocation2 + $0x70] sm:$0xff] %v619_v58  ;;  %v612_v3 = vadd.f32 %v1711_v1, %v451_v55  ;;  %v620_v4 = vadd.f32 %v1719_v2, %v459_v56  ;;  %v561_v5 = vpop.f32.mrb[7].mxu0  ;;  %v593_v6 = vpop.f32.mrb[7].mxu1  ;;  %1058 = vmatprep.subr.bf16.mxu1 (!%p1595_p12), %v1842_v35  ;;  %774 = vmatpush1.bf16.msra.mxu0 (!%p1595_p12), %v1844_v36  ;;  %v641_v42 = vld [vmem:[#allocation2] sm:$0xff] (!%p1595_p12)  ;;  %v1161_v47 = vld [vmem:[%s2030_s21 + $0x10] sm:$0xff] (!%p1595_p12) }
 0x133   : > { %625 = vst [vmem:[#allocation2 + $0x20] sm:$0xff] %v609_v63  ;;  %633 = vst [vmem:[#allocation2 + $0x60] sm:$0xff] %v617_v0  ;;  %v610_v7 = vadd.f32 %v561_v5, %v449_v61  ;;  %v618_v8 = vadd.f32 %v593_v6, %v457_v62  ;;  %775 = vmatprep.subr.bf16.mxu0 (!%p1595_p12), %v1846_v38  ;;  %v643_v48 = vld [vmem:[#allocation2 + $0x10] sm:$0xff] (!%p1595_p12)  ;;  %v644_v49 = vld [vmem:[#allocation2 + $0x18] sm:$0xff] (!%p1595_p12)  ;;  %1187 = vperm.xlu1 (!%p1595_p12), %1803, %v1161_v47   ;;  %v910_v30 = vsub.s32 (!%p1595_p12), 0, %v909_v28 }
 0x134   : > { %628 = vst [vmem:[#allocation2 + $0x38] sm:$0xff] %v612_v3  ;;  %636 = vst [vmem:[#allocation2 + $0x78] sm:$0xff] %v620_v4  ;;  %v642_v43 = vld [vmem:[#allocation2 + $0x8] sm:$0xff] (!%p1595_p12)  ;;  %v1162_v51 = vld [vmem:[%s2030_s21 + $0x18] sm:$0xff] (!%p1595_p12)  ;;  %v658_v52 = vpack.c.bf16 (!%p1595_p12), %v644_v49, %v643_v48  ;;  %v914_v32 = vsub.s32 (!%p1595_p12), 1, %v909_v28 }
 0x135   : > { %626 = vst [vmem:[#allocation2 + $0x28] sm:$0xff] %v610_v7  ;;  %634 = vst [vmem:[#allocation2 + $0x68] sm:$0xff] %v618_v8  ;;  %1059 = vmatpush1.bf16.msra.mxu1 (!%p1595_p12), %v1845_v37  ;;  %v657_v44 = vpack.c.bf16 (!%p1595_p12), %v642_v43, %v641_v42  ;;  %1182 = vperm.xlu0 (!%p1595_p12), %1802, %v1160_v50   ;;  %v1164_v54 = vld [vmem:[%s2030_s21 + $0x28] sm:$0xff] (!%p1595_p12)  ;;  %v1163_v55 = vld [vmem:[%s2030_s21 + $0x20] sm:$0xff] (!%p1595_p12) }
 0x136   : > { %1060 = vmatprep.subr.bf16.mxu1 %v1848_v39  ;;  %776 = vmatpush1.bf16.msra.mxu0 %v1850_v40  ;;  %v1166_v58 = vld [vmem:[%s2030_s21 + $0x38] sm:$0xff]  ;;  %v1165_v59 = vld [vmem:[%s2030_s21 + $0x30] sm:$0xff]  ;;  %v1168_v62 = vld [vmem:[%s2030_s21 + $0x48] sm:$0xff] }
 0x137   : > { %1192 = vperm.xlu1 %1803, %v1162_v51   ;;  %v1854_v61 = vld [vmem:[%s2025_s18 + $0x10] sm:$0xff]   ;;  %v1167_v63 = vld [vmem:[%s2030_s21 + $0x40] sm:$0xff]  ;;  %v1170_v2 = vld [vmem:[%s2030_s21 + $0x58] sm:$0xff] }
 0x138   : > { %v1169_v3 = vld [vmem:[%s2030_s21 + $0x50] sm:$0xff]  ;;  %v1855_v5 = vld [vmem:[%s2025_s18 + $0x18] sm:$0xff]   ;;  %v1172_v6 = vld [vmem:[%s2030_s21 + $0x68] sm:$0xff] }
 0x139   : > { %1061 = vmatpush1.bf16.msra.mxu1 %v1851_v41  ;;  %794 = vmatmul.mubr.bf16.vlgmr.msra.gmra.mrb[0].mxu0 %v657_v44  ;;  %v647_v0 = vld [vmem:[#allocation2 + $0x30] sm:$0xff]  ;;  %v1171_v7 = vld [vmem:[%s2030_s21 + $0x60] sm:$0xff]  ;;  %v650_v9 = vld [vmem:[#allocation2 + $0x48] sm:$0xff] }
 0x13a   : > { %803 = vmatprep.mubr.bf16.mxu0 %v1917_v11  ;;  %v645_v56 = vld [vmem:[#allocation2 + $0x20] sm:$0xff]  ;;  %1197 = vperm.xlu0 %1802, %v1163_v55   ;;  %v651_v15 = vld [vmem:[#allocation2 + $0x50] sm:$0xff]  ;;  %v652_v16 = vld [vmem:[#allocation2 + $0x58] sm:$0xff] }
 0x13b   : > { %1202 = vperm.xlu1 %1803, %v1164_v54   ;;  %v648_v1 = vld [vmem:[#allocation2 + $0x38] sm:$0xff]  ;;  %v649_v8 = vld [vmem:[#allocation2 + $0x40] sm:$0xff]  ;;  %v662_v17 = vpack.c.bf16 %v652_v16, %v651_v15  ;;  %v655_v23 = vld [vmem:[#allocation2 + $0x70] sm:$0xff] }
 0x13c   : > { %1079 = vmatmul.mubr.bf16.vlgmr.msra.gmra.mrb[0].mxu1 %v1852_v45  ;;  %v646_v57 = vld [vmem:[#allocation2 + $0x28] sm:$0xff]  ;;  %v660_v4 = vpack.c.bf16 %v648_v1, %v647_v0  ;;  %v661_v13 = vpack.c.bf16 %v650_v9, %v649_v8  ;;  %v653_v19 = vld [vmem:[#allocation2 + $0x60] sm:$0xff]  ;;  %v656_v24 = vld [vmem:[#allocation2 + $0x78] sm:$0xff] }
 0x13d   : > { %1088 = vmatprep.mubr.bf16.mxu1 %v1917_v11  ;;  %v659_v60 = vpack.c.bf16 %v646_v57, %v645_v56  ;;  %v654_v20 = vld [vmem:[#allocation2 + $0x68] sm:$0xff]  ;;  %v664_v25 = vpack.c.bf16 %v656_v24, %v655_v23  ;;  %v1859_v26 = vld [vmem:[%s2025_s18 + $0x38] sm:$0xff]   ;;  %v906_v31 = vld [vmem:[%s2278_s5] sm:$0x3] }
 0x13e   : > { %1207 = vperm.xlu0 %1802, %v1165_v59   ;;  %v663_v21 = vpack.c.bf16 %v654_v20, %v653_v19  ;;  %v2200_v33 = vrot.slane %v906_v31, %v910_v30  ;;  %v2202_v34 = vrot.slane %v906_v31, %v914_v32 }
 0x13f   : > { %1212 = vperm.xlu1 %1803, %v1166_v58  }
 0x141   : > { %804 = vmatmul.mubr.bf16.gmra.mrb[4].mxu0 %v658_v52 }
 0x142   : > { %813 = vmatprep.mubr.bf16.mxu0 %v1917_v11  ;;  %1217 = vperm.xlu0 %1802, %v1167_v63  }
 0x143   : > { %1222 = vperm.xlu1 %1803, %v1168_v62  }
 0x144   : > { %1089 = vmatmul.mubr.bf16.gmra.mrb[4].mxu1 %v1853_v53 }
 0x145   : > { %1098 = vmatprep.mubr.bf16.mxu1 %v1917_v11 }
 0x146   : > { %1227 = vperm.xlu0 %1802, %v1169_v3  }
 0x147   : > { %1232 = vperm.xlu1 %1803, %v1170_v2  }
 0x149   : > { %814 = vmatmul.mubr.bf16.gmra.mrb[8].mxu0 %v659_v60 }
 0x14a   : > { %823 = vmatprep.mubr.bf16.mxu0 %v1917_v11  ;;  %1237 = vperm.xlu0 %1802, %v1171_v7  }
 0x14b   : > { %1242 = vperm.xlu1 %1803, %v1172_v6  }
 0x14c   : > { %1099 = vmatmul.mubr.bf16.gmra.mrb[8].mxu1 %v1854_v61 }
 0x14d   : > { %1108 = vmatprep.mubr.bf16.mxu1 %v1917_v11 }
 0x14e   : > { %1247 = vperm.xlu0 %1802, %v1173_v12  }
 0x14f   : > { %1252 = vperm.xlu1 %1803, %v1174_v10  }
 0x151   : > { %824 = vmatmul.mubr.bf16.gmra.mrb[12].mxu0 %v660_v4 }
 0x152   : > { %833 = vmatprep.mubr.bf16.mxu0 %v1917_v11 }
 0x154   : > { %1109 = vmatmul.mubr.bf16.gmra.mrb[12].mxu1 %v1855_v5 }
 0x155   : > { %1118 = vmatprep.mubr.bf16.mxu1 %v1917_v11 }
 0x159   : > { %834 = vmatmul.mubr.bf16.gmra.mrb[16].mxu0 %v661_v13 }
 0x15a   : > { %843 = vmatprep.mubr.bf16.mxu0 %v1917_v11 }
 0x15c   : > { %1119 = vmatmul.mubr.bf16.gmra.mrb[16].mxu1 %v1856_v14 }
 0x15d   : > { %1128 = vmatprep.mubr.bf16.mxu1 %v1917_v11 }
 0x161   : > { %844 = vmatmul.mubr.bf16.gmra.mrb[20].mxu0 %v662_v17 }
 0x162   : > { %853 = vmatprep.mubr.bf16.mxu0 %v1917_v11 }
 0x164   : > { %1129 = vmatmul.mubr.bf16.gmra.mrb[20].mxu1 %v1857_v18 }
 0x165   : > { %1138 = vmatprep.mubr.bf16.mxu1 %v1917_v11 }
 0x169   : > { %854 = vmatmul.mubr.bf16.gmra.mrb[24].mxu0 %v663_v21 }
 0x16a   : > { %863 = vmatprep.mubr.bf16.mxu0 %v1917_v11 }
 0x16c   : > { %1139 = vmatmul.mubr.bf16.gmra.mrb[24].mxu1 %v1858_v22 }
 0x16d   : > { %1148 = vmatprep.mubr.bf16.mxu1 %v1917_v11 }
 0x171   : > { %864 = vmatmul.mubr.bf16.gmra.mrb[28].mxu0 %v664_v25 }
 0x174   : > { %1149 = vmatmul.mubr.bf16.gmra.mrb[28].mxu1 %v1859_v26 }
 0x1b0   : > { %v1178_v29 = vpop.permute.xlu0 %1177 }
 0x1b2   : > { %v1188_v35 = vpop.permute.xlu1 %1187 }
 0x1b4   : > { %v1183_v11 = vpop.permute.xlu0 %1182 }
 0x1b6   : > { %v1193_v59 = vpop.permute.xlu1 %1192 }
 0x1b9   : > { %v1198_v24 = vpop.permute.xlu0 %1197 }
 0x1ba   : > { %v1203_v23 = vpop.permute.xlu1 %1202 }
 0x20c   : > { %v795_v36 = vpop.f32.mrb[0].mxu0 }
 0x20d   : > { %v1255_v38 = vmul.f32 %v1178_v29, %v795_v36  ;;  %v797_v40 = vpop.f32.mrb[1].mxu0 }
 0x20e   : > { %v1256_v42 = vmul.f32 %v1178_v29, %v797_v40  ;;  %v799_v44 = vpop.f32.mrb[2].mxu0 }
 0x20f   : > { %v1080_v37 = vpop.f32.mrb[0].mxu1  ;;  %v1257_v47 = vmul.f32 %v1183_v11, %v799_v44  ;;  %v801_v49 = vpop.f32.mrb[3].mxu0 }
 0x210   : > { %v1081_v39 = vadd.f32 %v1080_v37, %v2200_v33  ;;  %v1082_v41 = vpop.f32.mrb[1].mxu1  ;;  %v1258_v52 = vmul.f32 %v1183_v11, %v801_v49 }
 0x211   : > { %v1083_v43 = vadd.f32 %v1082_v41, %v2202_v34  ;;  %v1084_v45 = vpop.f32.mrb[2].mxu1 }
 0x212   : > { %v1287_v46 = vadd.f32 %v1255_v38, %v1081_v39  ;;  %v1085_v48 = vadd.f32 %v1084_v45, %v2200_v33  ;;  %v1086_v50 = vpop.f32.mrb[3].mxu1 }
 0x213   : > { %v1288_v51 = vadd.f32 %v1256_v42, %v1083_v43  ;;  %v1087_v53 = vadd.f32 %v1086_v50, %v2202_v34 }
 0x214   : > { %v1319_v54 = vmax.f32 %v1287_v46, 0.0  ;;  %v1289_v55 = vadd.f32 %v1257_v47, %v1085_v48  ;;  %v805_v62 = vpop.f32.mrb[4].mxu0 }
 0x215   : > { %v1320_v56 = vmax.f32 %v1288_v51, 0.0  ;;  %v1290_v57 = vadd.f32 %v1258_v52, %v1087_v53  ;;  %v1259_v0 = vmul.f32 %v1188_v35, %v805_v62  ;;  %v807_v2 = vpop.f32.mrb[5].mxu0  ;;  %v1213_v51 = vpop.permute.xlu1 %1212 }
 0x216   : > { %v1321_v58 = vmax.f32 %v1289_v55, 0.0  ;;  %v1260_v5 = vmul.f32 %v1188_v35, %v807_v2  ;;  %v809_v7 = vpop.f32.mrb[6].mxu0  ;;  %v1208_v52 = vpop.permute.xlu0 %1207 }
 0x217   : > { %v1656_v60 = vpack.c.bf16 %v1320_v56, %v1319_v54  ;;  %v1322_v61 = vmax.f32 %v1290_v57, 0.0  ;;  %v1090_v63 = vpop.f32.mrb[4].mxu1  ;;  %v1261_v10 = vmul.f32 %v1193_v59, %v809_v7  ;;  %v811_v13 = vpop.f32.mrb[7].mxu0 }
 0x218   : > { %v1091_v1 = vadd.f32 %v1090_v63, %v2200_v33  ;;  %v1092_v3 = vpop.f32.mrb[5].mxu1  ;;  %v1262_v16 = vmul.f32 %v1193_v59, %v811_v13 }
 0x219   : > { %1447 = vst [vmem:[%s2035_s24] sm:$0xff] %v1656_v60  ;;  %v1657_v4 = vpack.c.bf16 %v1322_v61, %v1321_v58  ;;  %v1093_v6 = vadd.f32 %v1092_v3, %v2202_v34  ;;  %v1094_v8 = vpop.f32.mrb[6].mxu1 }
 0x21a   : > { %v1291_v9 = vadd.f32 %v1259_v0, %v1091_v1  ;;  %v1095_v12 = vadd.f32 %v1094_v8, %v2200_v33  ;;  %v1096_v14 = vpop.f32.mrb[7].mxu1 }
 0x21b   : > { %1448 = vst [vmem:[%s2035_s24 + $0x8] sm:$0xff] %v1657_v4  ;;  %v1292_v15 = vadd.f32 %v1260_v5, %v1093_v6  ;;  %v1097_v17 = vadd.f32 %v1096_v14, %v2202_v34 }
 0x21c   : > { %v1323_v18 = vmax.f32 %v1291_v9, 0.0  ;;  %v1293_v19 = vadd.f32 %v1261_v10, %v1095_v12  ;;  %v815_v27 = vpop.f32.mrb[8].mxu0 }
 0x21d   : > { %v1324_v20 = vmax.f32 %v1292_v15, 0.0  ;;  %v1294_v21 = vadd.f32 %v1262_v16, %v1097_v17  ;;  %v1263_v29 = vmul.f32 %v1198_v24, %v815_v27  ;;  %v817_v31 = vpop.f32.mrb[9].mxu0  ;;  %v1223_v16 = vpop.permute.xlu1 %1222 }
 0x21e   : > { %v1325_v22 = vmax.f32 %v1293_v19, 0.0  ;;  %v1264_v35 = vmul.f32 %v1198_v24, %v817_v31  ;;  %v819_v37 = vpop.f32.mrb[10].mxu0  ;;  %v1218_v17 = vpop.permute.xlu0 %1217 }
 0x21f   : > { %v1658_v25 = vpack.c.bf16 %v1324_v20, %v1323_v18  ;;  %v1326_v26 = vmax.f32 %v1294_v21, 0.0  ;;  %v1100_v28 = vpop.f32.mrb[8].mxu1  ;;  %v1265_v40 = vmul.f32 %v1203_v23, %v819_v37  ;;  %v821_v42 = vpop.f32.mrb[11].mxu0 }
 0x220   : > { %v1101_v30 = vadd.f32 %v1100_v28, %v2200_v33  ;;  %v1102_v32 = vpop.f32.mrb[9].mxu1  ;;  %v1266_v45 = vmul.f32 %v1203_v23, %v821_v42 }
 0x221   : > { %1449 = vst [vmem:[%s2035_s24 + $0x10] sm:$0xff] %v1658_v25  ;;  %v1659_v11 = vpack.c.bf16 %v1326_v26, %v1325_v22  ;;  %v1103_v36 = vadd.f32 %v1102_v32, %v2202_v34  ;;  %v1104_v38 = vpop.f32.mrb[10].mxu1 }
 0x222   : > { %v1295_v39 = vadd.f32 %v1263_v29, %v1101_v30  ;;  %v1105_v41 = vadd.f32 %v1104_v38, %v2200_v33  ;;  %v1106_v43 = vpop.f32.mrb[11].mxu1 }
 0x223   : > { %1450 = vst [vmem:[%s2035_s24 + $0x18] sm:$0xff] %v1659_v11  ;;  %v1296_v44 = vadd.f32 %v1264_v35, %v1103_v36  ;;  %v1107_v46 = vadd.f32 %v1106_v43, %v2202_v34 }
 0x224   : > { %v1327_v47 = vmax.f32 %v1295_v39, 0.0  ;;  %v1297_v48 = vadd.f32 %v1265_v40, %v1105_v41  ;;  %v825_v56 = vpop.f32.mrb[12].mxu0 }
 0x225   : > { %v1328_v49 = vmax.f32 %v1296_v44, 0.0  ;;  %v1298_v50 = vadd.f32 %v1266_v45, %v1107_v46  ;;  %v1267_v58 = vmul.f32 %v1208_v52, %v825_v56  ;;  %v827_v60 = vpop.f32.mrb[13].mxu0  ;;  %v1233_v45 = vpop.permute.xlu1 %1232 }
 0x226   : > { %v1329_v53 = vmax.f32 %v1297_v48, 0.0  ;;  %v1268_v63 = vmul.f32 %v1208_v52, %v827_v60  ;;  %v829_v1 = vpop.f32.mrb[14].mxu0  ;;  %v1228_v46 = vpop.permute.xlu0 %1227 }
 0x227   : > { %v1660_v54 = vpack.c.bf16 %v1328_v49, %v1327_v47  ;;  %v1330_v55 = vmax.f32 %v1298_v50, 0.0  ;;  %v1110_v57 = vpop.f32.mrb[12].mxu1  ;;  %v1269_v4 = vmul.f32 %v1213_v51, %v829_v1  ;;  %v831_v6 = vpop.f32.mrb[15].mxu0 }
 0x228   : > { %v1111_v59 = vadd.f32 %v1110_v57, %v2200_v33  ;;  %v1112_v61 = vpop.f32.mrb[13].mxu1  ;;  %v1270_v9 = vmul.f32 %v1213_v51, %v831_v6 }
 0x229   : > { %1451 = vst [vmem:[%s2035_s24 + $0x20] sm:$0xff] %v1660_v54  ;;  %v1661_v62 = vpack.c.bf16 %v1330_v55, %v1329_v53  ;;  %v1113_v0 = vadd.f32 %v1112_v61, %v2202_v34  ;;  %v1114_v2 = vpop.f32.mrb[14].mxu1 }
 0x22a   : > { %v1299_v3 = vadd.f32 %v1267_v58, %v1111_v59  ;;  %v1115_v5 = vadd.f32 %v1114_v2, %v2200_v33  ;;  %v1116_v7 = vpop.f32.mrb[15].mxu1 }
 0x22b   : > { %1452 = vst [vmem:[%s2035_s24 + $0x28] sm:$0xff] %v1661_v62  ;;  %v1300_v8 = vadd.f32 %v1268_v63, %v1113_v0  ;;  %v1117_v10 = vadd.f32 %v1116_v7, %v2202_v34 }
 0x22c   : > { %v1331_v12 = vmax.f32 %v1299_v3, 0.0  ;;  %v1301_v13 = vadd.f32 %v1269_v4, %v1115_v5  ;;  %v835_v21 = vpop.f32.mrb[16].mxu0 }
 0x22d   : > { %v1332_v14 = vmax.f32 %v1300_v8, 0.0  ;;  %v1302_v15 = vadd.f32 %v1270_v9, %v1117_v10  ;;  %v1271_v23 = vmul.f32 %v1218_v17, %v835_v21  ;;  %v837_v25 = vpop.f32.mrb[17].mxu0  ;;  %v1243_v9 = vpop.permute.xlu1 %1242 }
 0x22e   : > { %v1333_v18 = vmax.f32 %v1301_v13, 0.0  ;;  %v1272_v28 = vmul.f32 %v1218_v17, %v837_v25  ;;  %v839_v30 = vpop.f32.mrb[18].mxu0  ;;  %v1238_v10 = vpop.permute.xlu0 %1237 }
 0x22f   : > { %v1662_v19 = vpack.c.bf16 %v1332_v14, %v1331_v12  ;;  %v1334_v20 = vmax.f32 %v1302_v15, 0.0  ;;  %v1120_v22 = vpop.f32.mrb[16].mxu1  ;;  %v1273_v11 = vmul.f32 %v1223_v16, %v839_v30  ;;  %v841_v36 = vpop.f32.mrb[19].mxu0 }
 0x230   : > { %v1121_v24 = vadd.f32 %v1120_v22, %v2200_v33  ;;  %v1122_v26 = vpop.f32.mrb[17].mxu1  ;;  %v1274_v39 = vmul.f32 %v1223_v16, %v841_v36 }
 0x231   : > { %1453 = vst [vmem:[%s2035_s24 + $0x30] sm:$0xff] %v1662_v19  ;;  %v1663_v27 = vpack.c.bf16 %v1334_v20, %v1333_v18  ;;  %v1123_v29 = vadd.f32 %v1122_v26, %v2202_v34  ;;  %v1124_v31 = vpop.f32.mrb[18].mxu1 }
 0x232   : > { %v1303_v32 = vadd.f32 %v1271_v23, %v1121_v24  ;;  %v1125_v35 = vadd.f32 %v1124_v31, %v2200_v33  ;;  %v1126_v37 = vpop.f32.mrb[19].mxu1 }
 0x233   : > { %1454 = vst [vmem:[%s2035_s24 + $0x38] sm:$0xff] %v1663_v27  ;;  %v1304_v38 = vadd.f32 %v1272_v28, %v1123_v29  ;;  %v1127_v40 = vadd.f32 %v1126_v37, %v2202_v34 }
 0x234   : > { %v1335_v41 = vmax.f32 %v1303_v32, 0.0  ;;  %v1305_v42 = vadd.f32 %v1273_v11, %v1125_v35  ;;  %v845_v50 = vpop.f32.mrb[20].mxu0 }
 0x235   : > { %v1336_v43 = vmax.f32 %v1304_v38, 0.0  ;;  %v1306_v44 = vadd.f32 %v1274_v39, %v1127_v40  ;;  %v1275_v52 = vmul.f32 %v1228_v46, %v845_v50  ;;  %v847_v54 = vpop.f32.mrb[21].mxu0  ;;  %v1253_v39 = vpop.permute.xlu1 %1252 }
 0x236   : > { %v1337_v47 = vmax.f32 %v1305_v42, 0.0  ;;  %v1276_v57 = vmul.f32 %v1228_v46, %v847_v54  ;;  %v849_v59 = vpop.f32.mrb[22].mxu0  ;;  %v1248_v40 = vpop.permute.xlu0 %1247 }
 0x237   : > { %v1664_v48 = vpack.c.bf16 %v1336_v43, %v1335_v41  ;;  %v1338_v49 = vmax.f32 %v1306_v44, 0.0  ;;  %v1130_v51 = vpop.f32.mrb[20].mxu1  ;;  %v1277_v62 = vmul.f32 %v1233_v45, %v849_v59  ;;  %v851_v0 = vpop.f32.mrb[23].mxu0 }
 0x238   : > { %v1131_v53 = vadd.f32 %v1130_v51, %v2200_v33  ;;  %v1132_v55 = vpop.f32.mrb[21].mxu1  ;;  %v1278_v3 = vmul.f32 %v1233_v45, %v851_v0 }
 0x239   : > { %1455 = vst [vmem:[%s2035_s24 + $0x40] sm:$0xff] %v1664_v48  ;;  %v1665_v56 = vpack.c.bf16 %v1338_v49, %v1337_v47  ;;  %v1133_v58 = vadd.f32 %v1132_v55, %v2202_v34  ;;  %v1134_v60 = vpop.f32.mrb[22].mxu1 }
 0x23a   : > { %v1307_v61 = vadd.f32 %v1275_v52, %v1131_v53  ;;  %v1135_v63 = vadd.f32 %v1134_v60, %v2200_v33  ;;  %v1136_v1 = vpop.f32.mrb[23].mxu1 }
 0x23b   : > { %1456 = vst [vmem:[%s2035_s24 + $0x48] sm:$0xff] %v1665_v56  ;;  %v1308_v2 = vadd.f32 %v1276_v57, %v1133_v58  ;;  %v1137_v4 = vadd.f32 %v1136_v1, %v2202_v34 }
 0x23c   : > { %v1339_v5 = vmax.f32 %v1307_v61, 0.0  ;;  %v1309_v6 = vadd.f32 %v1277_v62, %v1135_v63  ;;  %v855_v15 = vpop.f32.mrb[24].mxu0 }
 0x23d   : > { %v1340_v7 = vmax.f32 %v1308_v2, 0.0  ;;  %v1310_v8 = vadd.f32 %v1278_v3, %v1137_v4  ;;  %v1279_v17 = vmul.f32 %v1238_v10, %v855_v15  ;;  %v857_v19 = vpop.f32.mrb[25].mxu0 }
 0x23e   : > { %v1341_v12 = vmax.f32 %v1309_v6, 0.0  ;;  %v1280_v22 = vmul.f32 %v1238_v10, %v857_v19  ;;  %v859_v24 = vpop.f32.mrb[26].mxu0 }
 0x23f   : > { %v1666_v13 = vpack.c.bf16 %v1340_v7, %v1339_v5  ;;  %v1342_v14 = vmax.f32 %v1310_v8, 0.0  ;;  %v1140_v16 = vpop.f32.mrb[24].mxu1  ;;  %v1281_v27 = vmul.f32 %v1243_v9, %v859_v24  ;;  %v861_v29 = vpop.f32.mrb[27].mxu0 }
 0x240   : > { %v1141_v18 = vadd.f32 %v1140_v16, %v2200_v33  ;;  %v1142_v20 = vpop.f32.mrb[25].mxu1  ;;  %v1282_v32 = vmul.f32 %v1243_v9, %v861_v29 }
 0x241   : > { %1457 = vst [vmem:[%s2035_s24 + $0x50] sm:$0xff] %v1666_v13  ;;  %v1667_v21 = vpack.c.bf16 %v1342_v14, %v1341_v12  ;;  %v1143_v23 = vadd.f32 %v1142_v20, %v2202_v34  ;;  %v1144_v25 = vpop.f32.mrb[26].mxu1 }
 0x242   : > { %v1311_v26 = vadd.f32 %v1279_v17, %v1141_v18  ;;  %v1145_v28 = vadd.f32 %v1144_v25, %v2200_v33  ;;  %v1146_v30 = vpop.f32.mrb[27].mxu1 }
 0x243   : > { %1458 = vst [vmem:[%s2035_s24 + $0x58] sm:$0xff] %v1667_v21  ;;  %v1312_v31 = vadd.f32 %v1280_v22, %v1143_v23  ;;  %v1147_v11 = vadd.f32 %v1146_v30, %v2202_v34 }
 0x244   : > { %v1343_v35 = vmax.f32 %v1311_v26, 0.0  ;;  %v1313_v36 = vadd.f32 %v1281_v27, %v1145_v28  ;;  %v865_v44 = vpop.f32.mrb[28].mxu0 }
 0x245   : > { %v1344_v37 = vmax.f32 %v1312_v31, 0.0  ;;  %v1314_v38 = vadd.f32 %v1282_v32, %v1147_v11  ;;  %v1283_v46 = vmul.f32 %v1248_v40, %v865_v44  ;;  %v867_v48 = vpop.f32.mrb[29].mxu0 }
 0x246   : > { %v1345_v41 = vmax.f32 %v1313_v36, 0.0  ;;  %v1284_v51 = vmul.f32 %v1248_v40, %v867_v48  ;;  %v869_v53 = vpop.f32.mrb[30].mxu0 }
 0x247   : > { %v1668_v42 = vpack.c.bf16 %v1344_v37, %v1343_v35  ;;  %v1346_v43 = vmax.f32 %v1314_v38, 0.0  ;;  %v1150_v45 = vpop.f32.mrb[28].mxu1  ;;  %v1285_v56 = vmul.f32 %v1253_v39, %v869_v53  ;;  %v871_v58 = vpop.f32.mrb[31].mxu0 }
 0x248   : > { %v1151_v47 = vadd.f32 %v1150_v45, %v2200_v33  ;;  %v1152_v49 = vpop.f32.mrb[29].mxu1  ;;  %v1286_v61 = vmul.f32 %v1253_v39, %v871_v58 }
 0x249   : > { %1459 = vst [vmem:[%s2035_s24 + $0x60] sm:$0xff] %v1668_v42  ;;  %v1669_v50 = vpack.c.bf16 %v1346_v43, %v1345_v41  ;;  %v1153_v52 = vadd.f32 %v1152_v49, %v2202_v34  ;;  %v1154_v54 = vpop.f32.mrb[30].mxu1 }
 0x24a   : > { %v1315_v55 = vadd.f32 %v1283_v46, %v1151_v47  ;;  %v1155_v57 = vadd.f32 %v1154_v54, %v2200_v33  ;;  %v1156_v59 = vpop.f32.mrb[31].mxu1 }
 0x24b   : > { %1460 = vst [vmem:[%s2035_s24 + $0x68] sm:$0xff] %v1669_v50  ;;  %v1316_v60 = vadd.f32 %v1284_v51, %v1153_v52  ;;  %v1157_v62 = vadd.f32 %v1156_v59, %v2202_v34 }
 0x24c   : > { %v1347_v63 = vmax.f32 %v1315_v55, 0.0  ;;  %v1317_v0 = vadd.f32 %v1285_v56, %v1155_v57 }
 0x24d   : > { %v1348_v1 = vmax.f32 %v1316_v60, 0.0  ;;  %v1318_v2 = vadd.f32 %v1286_v61, %v1157_v62 }
 0x24e   : > { %v1349_v3 = vmax.f32 %v1317_v0, 0.0 }
 0x24f   : > { %v1670_v4 = vpack.c.bf16 %v1348_v1, %v1347_v63  ;;  %v1350_v5 = vmax.f32 %v1318_v2, 0.0 }
 0x251   : > { %1461 = vst [vmem:[%s2035_s24 + $0x70] sm:$0xff] %v1670_v4  ;;  %v1671_v6 = vpack.c.bf16 %v1350_v5, %v1349_v3 }
 0x253   : > { %1462 = vst [vmem:[%s2035_s24 + $0x78] sm:$0xff] %v1671_v6 }
 0x254 PF: > { %s17_s30 = sadd.s32 1, %s1914_s30   ;;  %s2281_s24 = smov %s1894_s25 }
 0x255   : > { %p14_p13 = scmp.ge.s32.totalorder %s17_s30, 6   ;;  %s2282_s25 = smov %s2009_s14 }
 0x256   : > { %s2283_s26 = smov %s1906_s28  ;;  %s2284_s27 = smov %s1910_s29 }
 0x257   : > { %s2285_s28 = smov %s2288_s8  ;;  %s2286_s29 = smov %s2292_s9 }
 0x258   :  { %16 = sbr.rel (!%p14_p13) target bundleno = 4 (0x4), region = 136 }

// kernel: graphsage_forward.5
= control target key start
LH: loop header
LB: loop body
LE: loop exit
PB: predicated region body
PF: predicated region fallthrough
CT: control target
= control target key end

     0   :  { %s1616_s21 = smov 0   ;;  %s1618_s22 = smov 0   ;;  %s1870_s0 = inlined_call_operand.vmem [shape: s8[256,256], index: 0, kind: input, shape index: {}]   ;;  %s1871_s1 = inlined_call_operand.vmem [shape: bf16[256,128], index: 1, kind: input, shape index: {}]   ;;  %s1872_s2 = inlined_call_operand.vmem [shape: bf16[256,256], index: 2, kind: input, shape index: {}]   ;;  %s1873_s3 = inlined_call_operand.vmem [shape: bf16[256,128], index: 3, kind: input, shape index: {}]   ;;  %s1874_s4 = inlined_call_operand.vmem [shape: f32[1,128], index: 4, kind: input, shape index: {}]   ;;  %s1875_s5 = inlined_call_operand.vmem [shape: f32[256,1], index: 5, kind: input, shape index: {}]   ;;  %s1876_s6 = inlined_call_operand.vmem [shape: f32[256,128], index: 6, kind: output, shape index: {}]  }
   0x1   :  { %s1620_s23 = smov 0   ;;  %s1622_s24 = smov 0  }
   0x2   :  { %s1624_s25 = smov 0   ;;  %s1626_s26 = smov 0  }
   0x3   :  { %s1628_s27 = smov 0  }
   0x4 LB: > { %s25_s28 = sadd.s32 1, %s1569_s25  ;;  %s28_s29 = sadd.s32 1, %s1573_s26  ;;  %s1577_s27 = sphi %s1628_s27, %s16_s27   ;;  %s1573_s26 = sphi %s1626_s26, %s1882_s26   ;;  %s1569_s25 = sphi %s1624_s25, %s1881_s25   ;;  %s1565_s24 = sphi %s1622_s24, %s1880_s24   ;;  %s1561_s23 = sphi %s1620_s23, %s1879_s23   ;;  %s1557_s22 = sphi %s1618_s22, %s1878_s22   ;;  %s1553_s21 = sphi %s1616_s21, %s1877_s21  }
   0x5   : > { %p26_p0 = scmp.ge.s32.totalorder %s25_s28, 2  ;;  %p44_p1 = scmp.ne.s32.totalorder %s1557_s22, %s1553_s21 }
   0x6   : > { %p45_p2 = scmp.eq.s32.totalorder %s1577_s27, 0  ;;  %s37_s9 = sadd.s32 1, %s1557_s22 }
   0x7   : > { %s1884_s28 = smov (%p26_p0, %s25_s28), 0  ;;  %s1886_s29 = smov (!%p26_p0, %s28_s29), %s1573_s26 }
   0x8   : > { %p46_p3 = por %p45_p2, %p44_p1  ;;  %p30_p4 = scmp.ge.s32.totalorder %s1886_s29, 2 }
   0x9   : > { %s33_s30 = ssub.s32 %s1569_s25, %s1884_s28  ;;  %p1208_p6 = scmp.ge.s32.totalorder %s1577_s27, 4 }
   0xa   : > { %s1888_s29 = smov (%p30_p4, %s1886_s29), 0 }
   0xb   : > { %s32_s7 = ssub.s32 %s1573_s26, %s1888_s29  ;;  %220 = sbr.rel (%p1208_p6) target bundleno = 26 (0x1a), region = 28 }
   0xc   : > { %s34_s8 = sor.u32 %s33_s30, %s32_s7 }
   0xd   : > { %p35_p5 = scmp.eq.s32.totalorder %s34_s8, 0 }
   0xf   : > { %s1667_s10 = scalar_select %p35_p5, %s1557_s22, %s37_s9  }
  0x12   : > { %223 = sbr.rel (!%p46_p3) target bundleno = 26 (0x1a), region = 32  ;;  %s225_s11 = sand.u32 (%p46_p3), 1, %s1557_s22  }
  0x13   : > { %s1269_s12 = sshll.u32 (%p46_p3), %s1573_s26, 3  ;;  %s1209_s13 = sshll.u32 (%p46_p3), %s225_s11, 5 }
  0x14   : > { %s230_s14 = sadd.s32 (%p46_p3), %s1569_s25, %s1269_s12  ;;  %s227_s19 = scalar_lea.vmem (%p46_p3), [#allocation3], %s1209_s13 }
  0x15   : > { %s1212_s15 = sshll.u32 (%p46_p3), %s230_s14, 3 }
  0x16   : > { %s232_s18 = scalar_lea.vmem (%p46_p3), %s1870_s0, %s1212_s15 }
  0x17   : > { %v266_v0 = vld [vmem:[%s232_s18] sm:$0xff] (%p46_p3)  ;;  %v268_v1 = vld [vmem:[%s232_s18 + $0x10] sm:$0xff] (%p46_p3) }
  0x18   : > { %v270_v2 = vld [vmem:[%s232_s18 + $0x20] sm:$0xff] (%p46_p3)  ;;  %267 = vst [vmem:[%s227_s19] sm:$0xff] (%p46_p3), %v266_v0  ;;  %269 = vst [vmem:[%s227_s19 + $0x8] sm:$0xff] (%p46_p3), %v268_v1  ;;  %v272_v3 = vld [vmem:[%s232_s18 + $0x30] sm:$0xff] (%p46_p3) }
  0x19   : > { %271 = vst [vmem:[%s227_s19 + $0x10] sm:$0xff] %v270_v2  ;;  %273 = vst [vmem:[%s227_s19 + $0x18] sm:$0xff] %v272_v3 }
  0x1a PF: > { %p1213_p7 = scmp.ge.s32.totalorder %s1577_s27, 1  ;;  %p297_p8 = scmp.lt.s32.totalorder %s1577_s27, 5 }
  0x1c   : > { %p298_p9 = pnand %p1213_p7, %p297_p8 }
  0x1d   : > { %s304_s20 = sand.u32 (!%p298_p9), 1, %s1553_s21   ;;  %s1215_s30 = sshll.u32 (!%p298_p9), %s1565_s24, 4 }
  0x1e   : > { %301 = sbr.rel (%p298_p9) target bundleno = 550 (0x226), region = 78  ;;  %s1214_s7 = sshll.u32 (!%p298_p9), %s304_s20, 5 }
  0x1f   : > { %p346_p10 = scmp.lt.s32.totalorder (!%p298_p9), %s1215_s30, 31  ;;  %s1695_s21 = scalar_lea.vmem (!%p298_p9), [#allocation3], %s1214_s7 }
  0x20   : > { %p1222_p11 = scmp.ne.s32.totalorder (!%p298_p9), %s1561_s23, 0 }
  0x25   : > { %s1890_s30 = smov (!%p346_p10, %s1215_s30), 31  ;;  %368 = sbr.rel (%p1222_p11) target bundleno = 47 (0x2f), region = 86 }
  0x26   : > { %s1270_s8 = sshll.u32 %s1890_s30, 3  ;;  %v1579_v4 = vmov (!%p1222_p11), 0.0  }
  0x27   : > { %s1683_s12 = scalar_lea.vmem %s1872_s2, %s1270_s8  ;;  %s1688_s15 = scalar_lea.vmem %s1875_s5, %s1270_s8  ;;  %369 = vst [vmem:[#allocation2] sm:$0xff] (!%p1222_p11), %v1579_v4  ;;  %370 = vst [vmem:[#allocation2 + $0x8] sm:$0xff] (!%p1222_p11), %v1579_v4 }
  0x28   : > { %s1693_s18 = scalar_lea.vmem %s1876_s6, %s1270_s8  ;;  %371 = vst [vmem:[#allocation2 + $0x10] sm:$0xff] (!%p1222_p11), %v1579_v4  ;;  %372 = vst [vmem:[#allocation2 + $0x18] sm:$0xff] (!%p1222_p11), %v1579_v4 }
  0x29   : > { %373 = vst [vmem:[#allocation2 + $0x20] sm:$0xff] (!%p1222_p11), %v1579_v4  ;;  %374 = vst [vmem:[#allocation2 + $0x28] sm:$0xff] (!%p1222_p11), %v1579_v4 }
  0x2a   : > { %375 = vst [vmem:[#allocation2 + $0x30] sm:$0xff] (!%p1222_p11), %v1579_v4  ;;  %376 = vst [vmem:[#allocation2 + $0x38] sm:$0xff] (!%p1222_p11), %v1579_v4 }
  0x2b   : > { %377 = vst [vmem:[#allocation2 + $0x40] sm:$0xff] (!%p1222_p11), %v1579_v4  ;;  %378 = vst [vmem:[#allocation2 + $0x48] sm:$0xff] (!%p1222_p11), %v1579_v4 }
  0x2c   : > { %379 = vst [vmem:[#allocation2 + $0x50] sm:$0xff] %v1579_v4  ;;  %380 = vst [vmem:[#allocation2 + $0x58] sm:$0xff] %v1579_v4 }
  0x2d   : > { %381 = vst [vmem:[#allocation2 + $0x60] sm:$0xff] %v1579_v4  ;;  %382 = vst [vmem:[#allocation2 + $0x68] sm:$0xff] %v1579_v4 }
  0x2e   : > { %383 = vst [vmem:[#allocation2 + $0x70] sm:$0xff] %v1579_v4  ;;  %384 = vst [vmem:[#allocation2 + $0x78] sm:$0xff] %v1579_v4 }
  0x2f PF: > { %s1223_s24 = sshll.u32 %s1561_s23, 7  ;;  %v406_v5 = vld [vmem:[%s1695_s21] sm:$0xff]  ;;  %v408_v6 = vld [vmem:[%s1695_s21 + $0x10] sm:$0xff]  ;;  %v407_v17 = vld [vmem:[%s1695_s21 + $0x8] sm:$0xff]  ;;  %p1233_p12 = scmp.ne.s32.totalorder %s1561_s23, 1 }
  0x30   : > { %s386_s19 = sshra.s32 %s1223_s24, 3  ;;  %v410_v7 = vunpack.c.l.s8.bf16 %v406_v5  ;;  %v414_v8 = vunpack.c.l.s8.bf16 %v408_v6  ;;  %v409_v18 = vld [vmem:[%s1695_s21 + $0x18] sm:$0xff]  ;;  %v411_v19 = vunpack.c.h.s8.bf16 %v406_v5  ;;  %v415_v20 = vunpack.c.h.s8.bf16 %v408_v6 }
  0x31   : > { %s1224_s20 = sshll.u32 %s386_s19, 2  ;;  %v412_v21 = vunpack.c.l.s8.bf16 %v407_v17  ;;  %v416_v22 = vunpack.c.l.s8.bf16 %v409_v18  ;;  %v413_v23 = vunpack.c.h.s8.bf16 %v407_v17  ;;  %v417_v24 = vunpack.c.h.s8.bf16 %v409_v18  ;;  %v418_v27 = vld [vmem:[#allocation2] sm:$0xff]  ;;  %v419_v37 = vld [vmem:[#allocation2 + $0x8] sm:$0xff]  ;;  %v1490_v17 = vld [vmem:[%s1873_s3 + $0x18] sm:$0xff] (!%p1233_p12)  }
  0x32   : > { %s1704_s8 = scalar_lea.vmem %s1871_s1, %s1224_s20  ;;  %1367 = vmatprep.mubr.bf16.mxu0 %v410_v7  ;;  %1375 = vmatprep.mubr.bf16.mxu1 %v414_v8  ;;  %v420_v25 = vld [vmem:[#allocation2 + $0x10] sm:$0xff]  ;;  %v421_v31 = vld [vmem:[#allocation2 + $0x18] sm:$0xff]  ;;  %v1491_v18 = vld [vmem:[%s1873_s3 + $0x60] sm:$0xff] (!%p1233_p12)  }
  0x33   : > { %v1473_v9 = vld [vmem:[%s1704_s8] sm:$0xff]   ;;  %v1474_v10 = vld [vmem:[%s1704_s8 + $0x8] sm:$0xff]   ;;  %v1475_v11 = vld [vmem:[%s1704_s8 + $0x10] sm:$0xff]  }
  0x34   : > { %1351 = vmatprep.subr.bf16.mxu0 %v1473_v9  ;;  %1383 = vmatprep.subr.bf16.mxu1 %v1473_v9  ;;  %v1476_v12 = vld [vmem:[%s1704_s8 + $0x18] sm:$0xff]   ;;  %v1477_v13 = vld [vmem:[%s1704_s8 + $0x20] sm:$0xff]   ;;  %v1478_v14 = vld [vmem:[%s1704_s8 + $0x28] sm:$0xff]  }
  0x35   : > { %1352 = vmatpush3.bf16.msra.mxu0 %v1473_v9  ;;  %1391 = vmatpush3.bf16.msra.mxu1 %v1473_v9  ;;  %v1479_v15 = vld [vmem:[%s1704_s8 + $0x30] sm:$0xff]   ;;  %v1480_v16 = vld [vmem:[%s1704_s8 + $0x38] sm:$0xff]   ;;  %v426_v28 = vld [vmem:[#allocation2 + $0x40] sm:$0xff] }
  0x36   : > { %1353 = vmatprep.subr.bf16.mxu0 %v1474_v10  ;;  %1384 = vmatprep.subr.bf16.mxu1 %v1474_v10  ;;  %v428_v26 = vld [vmem:[#allocation2 + $0x50] sm:$0xff]  ;;  %v429_v32 = vld [vmem:[#allocation2 + $0x58] sm:$0xff]  ;;  %v427_v38 = vld [vmem:[#allocation2 + $0x48] sm:$0xff] }
  0x37   : > { %v424_v49 = vld [vmem:[#allocation2 + $0x30] sm:$0xff]  ;;  %v422_v51 = vld [vmem:[#allocation2 + $0x20] sm:$0xff]  ;;  %v425_v55 = vld [vmem:[#allocation2 + $0x38] sm:$0xff] }
  0x38   : > { %v432_v50 = vld [vmem:[#allocation2 + $0x70] sm:$0xff]  ;;  %v430_v52 = vld [vmem:[#allocation2 + $0x60] sm:$0xff]  ;;  %v433_v56 = vld [vmem:[#allocation2 + $0x78] sm:$0xff] }
  0x39   : > { %1354 = vmatpush3.bf16.msra.mxu0 %v1474_v10  ;;  %1392 = vmatpush3.bf16.msra.mxu1 %v1474_v10  ;;  %v423_v61 = vld [vmem:[#allocation2 + $0x28] sm:$0xff]  ;;  %v1483_v9 = vld [vmem:[%s1873_s3 + $0x40] sm:$0xff] (!%p1233_p12)  }
  0x3a   : > { %1355 = vmatprep.subr.bf16.mxu0 %v1475_v11  ;;  %1385 = vmatprep.subr.bf16.mxu1 %v1475_v11  ;;  %v431_v62 = vld [vmem:[#allocation2 + $0x68] sm:$0xff]  ;;  %v1484_v10 = vld [vmem:[%s1873_s3] sm:$0xff] (!%p1233_p12)  }
  0x3d   : > { %1356 = vmatpush3.bf16.msra.mxu0 %v1475_v11  ;;  %1393 = vmatpush3.bf16.msra.mxu1 %v1475_v11  ;;  %v1580_v11 = vmov (!%p1233_p12), 0  }
  0x3e   : > { %1357 = vmatprep.subr.bf16.mxu0 %v1476_v12  ;;  %1386 = vmatprep.subr.bf16.mxu1 %v1476_v12 }
  0x3f   : > { %1482 = vset.pattern.permute.xlu1 (!%p1233_p12), %v1580_v11  ;;  %1481 = vset.pattern.permute.xlu0 (!%p1233_p12), %v1580_v11 }
  0x41   : > { %1358 = vmatpush3.bf16.msra.mxu0 %v1476_v12  ;;  %1394 = vmatpush3.bf16.msra.mxu1 %v1476_v12  ;;  %v1485_v12 = vld [vmem:[%s1873_s3 + $0x48] sm:$0xff] (!%p1233_p12)  }
  0x42   : > { %1359 = vmatprep.subr.bf16.mxu0 %v1477_v13  ;;  %1387 = vmatprep.subr.bf16.mxu1 %v1477_v13 }
  0x45   : > { %1360 = vmatpush3.bf16.msra.mxu0 %v1477_v13  ;;  %1395 = vmatpush3.bf16.msra.mxu1 %v1477_v13  ;;  %v1486_v13 = vld [vmem:[%s1873_s3 + $0x8] sm:$0xff] (!%p1233_p12)  }
  0x46   : > { %1361 = vmatprep.subr.bf16.mxu0 %v1478_v14  ;;  %1388 = vmatprep.subr.bf16.mxu1 %v1478_v14 }
  0x49   : > { %1362 = vmatpush3.bf16.msra.mxu0 %v1478_v14  ;;  %1396 = vmatpush3.bf16.msra.mxu1 %v1478_v14  ;;  %v1487_v14 = vld [vmem:[%s1873_s3 + $0x50] sm:$0xff] (!%p1233_p12)  }
  0x4a   : > { %1363 = vmatprep.subr.bf16.mxu0 %v1479_v15  ;;  %1389 = vmatprep.subr.bf16.mxu1 %v1479_v15 }
  0x4d   : > { %1364 = vmatpush3.bf16.msra.mxu0 %v1479_v15  ;;  %1397 = vmatpush3.bf16.msra.mxu1 %v1479_v15  ;;  %v1488_v15 = vld [vmem:[%s1873_s3 + $0x10] sm:$0xff] (!%p1233_p12)  }
  0x4e   : > { %1365 = vmatprep.subr.bf16.mxu0 %v1480_v16  ;;  %1390 = vmatprep.subr.bf16.mxu1 %v1480_v16 }
  0x51   : > { %1366 = vmatpush3.bf16.msra.mxu0 %v1480_v16  ;;  %1398 = vmatpush3.bf16.msra.mxu1 %v1480_v16  ;;  %v1489_v16 = vld [vmem:[%s1873_s3 + $0x58] sm:$0xff] (!%p1233_p12)  }
  0x52   : > { %1287 = vmatprep.subr.bf16.mxu0 (!%p1233_p12), %v1483_v9  ;;  %1399 = vmatprep.subr.bf16.mxu1 (!%p1233_p12), %v1483_v9 }
  0x54   : > { %1368 = vmatmul.mubr.bf16.vlgmr.msra.gmra.mrb[0].mxu0 %v411_v19  ;;  %1376 = vmatmul.mubr.bf16.vlgmr.msra.gmra.mrb[0].mxu1 %v415_v20  ;;  %v1492_v19 = vld [vmem:[%s1873_s3 + $0x20] sm:$0xff] (!%p1233_p12)   ;;  %v1493_v20 = vld [vmem:[%s1873_s3 + $0x68] sm:$0xff] (!%p1233_p12)  }
  0x55   : > { %1371 = vmatprep.mubr.bf16.mxu0 %v412_v21  ;;  %1379 = vmatprep.mubr.bf16.mxu1 %v416_v22  ;;  %v1501_v21 = vld [vmem:[%s1683_s12 + $0x4] ss:$8 sps:$4 sm:$0xff] (!%p1233_p12)  }
  0x56   : > { %1288 = vmatpush3.bf16.msra.mxu0 (!%p1233_p12), %v1484_v10  ;;  %1407 = vmatpush3.bf16.msra.mxu1 (!%p1233_p12), %v1484_v10  ;;  %v1504_v22 = vld [vmem:[%s1683_s12 + $0x44] ss:$8 sps:$4 sm:$0xff] (!%p1233_p12)  }
  0x57   : > { %1289 = vmatprep.subr.bf16.mxu0 (!%p1233_p12), %v1485_v12  ;;  %1400 = vmatprep.subr.bf16.mxu1 (!%p1233_p12), %v1485_v12 }
  0x5a   : > { %1290 = vmatpush3.bf16.msra.mxu0 (!%p1233_p12), %v1486_v13  ;;  %1408 = vmatpush3.bf16.msra.mxu1 (!%p1233_p12), %v1486_v13 }
  0x5b   : > { %1291 = vmatprep.subr.bf16.mxu0 (!%p1233_p12), %v1487_v14  ;;  %1401 = vmatprep.subr.bf16.mxu1 (!%p1233_p12), %v1487_v14 }
  0x5c   : > { %1372 = vmatmul.mubr.bf16.gmra.mrb[4].mxu0 %v413_v23  ;;  %1380 = vmatmul.mubr.bf16.gmra.mrb[4].mxu1 %v417_v24  ;;  %v1494_v23 = vld [vmem:[%s1873_s3 + $0x28] sm:$0xff] (!%p1233_p12)   ;;  %v1495_v24 = vld [vmem:[%s1873_s3 + $0x70] sm:$0xff] (!%p1233_p12)  }
  0x5d   : > { %894 = vmatprep.mubr.bf16.mxu0 (!%p1233_p12), %v1501_v21  ;;  %926 = vmatprep.mubr.bf16.mxu1 (!%p1233_p12), %v1504_v22 }
  0x5e   : > { %1292 = vmatpush3.bf16.msra.mxu0 (!%p1233_p12), %v1488_v15  ;;  %1409 = vmatpush3.bf16.msra.mxu1 (!%p1233_p12), %v1488_v15 }
  0x5f   : > { %1293 = vmatprep.subr.bf16.mxu0 (!%p1233_p12), %v1489_v16  ;;  %1402 = vmatprep.subr.bf16.mxu1 (!%p1233_p12), %v1489_v16 }
  0x62   : > { %1294 = vmatpush3.bf16.msra.mxu0 (!%p1233_p12), %v1490_v17  ;;  %1410 = vmatpush3.bf16.msra.mxu1 (!%p1233_p12), %v1490_v17 }
  0x63   : > { %1295 = vmatprep.subr.bf16.mxu0 (!%p1233_p12), %v1491_v18  ;;  %1403 = vmatprep.subr.bf16.mxu1 (!%p1233_p12), %v1491_v18 }
  0x66   : > { %1296 = vmatpush3.bf16.msra.mxu0 (!%p1233_p12), %v1492_v19  ;;  %1411 = vmatpush3.bf16.msra.mxu1 (!%p1233_p12), %v1492_v19 }
  0x67   : > { %1297 = vmatprep.subr.bf16.mxu0 (!%p1233_p12), %v1493_v20  ;;  %1404 = vmatprep.subr.bf16.mxu1 (!%p1233_p12), %v1493_v20 }
  0x6a   : > { %1298 = vmatpush3.bf16.msra.mxu0 (!%p1233_p12), %v1494_v23  ;;  %1412 = vmatpush3.bf16.msra.mxu1 (!%p1233_p12), %v1494_v23 }
  0x6b   : > { %1299 = vmatprep.subr.bf16.mxu0 (!%p1233_p12), %v1495_v24  ;;  %1405 = vmatprep.subr.bf16.mxu1 (!%p1233_p12), %v1495_v24 }
 0x127   : > { %v1369_v29 = vpop.f32.mrb[0].mxu0  ;;  %v1377_v30 = vpop.f32.mrb[0].mxu1 }
 0x128   : > { %v581_v33 = vadd.f32 %v1369_v29, %v420_v25  ;;  %v589_v34 = vadd.f32 %v1377_v30, %v428_v26  ;;  %v516_v35 = vpop.f32.mrb[1].mxu0  ;;  %v548_v36 = vpop.f32.mrb[1].mxu1  ;;  %v1496_v25 = vld [vmem:[%s1873_s3 + $0x30] sm:$0xff] (!%p1233_p12)   ;;  %v1497_v26 = vld [vmem:[%s1873_s3 + $0x78] sm:$0xff] (!%p1233_p12)   ;;  %v959_v29 = vld [vmem:[%s1688_s15] sm:$0xff] (!%p1233_p12) }
 0x129   : > { %v579_v39 = vadd.f32 %v516_v35, %v418_v27  ;;  %v587_v40 = vadd.f32 %v548_v36, %v426_v28  ;;  %v1370_v41 = vpop.f32.mrb[2].mxu0  ;;  %v1378_v42 = vpop.f32.mrb[2].mxu1  ;;  %v961_v27 = vld [vmem:[%s1688_s15 + $0x10] sm:$0xff] (!%p1233_p12)  ;;  %1300 = vmatpush3.bf16.msra.mxu0 (!%p1233_p12), %v1496_v25  ;;  %1413 = vmatpush3.bf16.msra.mxu1 (!%p1233_p12), %v1496_v25  ;;  %v1498_v28 = vld [vmem:[%s1873_s3 + $0x38] sm:$0xff] (!%p1233_p12)   ;;  %v1499_v30 = vld [vmem:[%s1683_s12] ss:$8 sps:$4 sm:$0xff] (!%p1233_p12)  }
 0x12a   : > { %597 = vst [vmem:[#allocation2 + $0x10] sm:$0xff] %v581_v33  ;;  %605 = vst [vmem:[#allocation2 + $0x50] sm:$0xff] %v589_v34  ;;  %v582_v43 = vadd.f32 %v1370_v41, %v421_v31  ;;  %v590_v44 = vadd.f32 %v1378_v42, %v429_v32  ;;  %v519_v45 = vpop.f32.mrb[3].mxu0  ;;  %v551_v46 = vpop.f32.mrb[3].mxu1  ;;  %1301 = vmatprep.subr.bf16.mxu0 (!%p1233_p12), %v1497_v26  ;;  %1406 = vmatprep.subr.bf16.mxu1 (!%p1233_p12), %v1497_v26  ;;  %v1502_v31 = vld [vmem:[%s1683_s12 + $0x40] ss:$8 sps:$4 sm:$0xff] (!%p1233_p12)  }
 0x12b   : > { %595 = vst [vmem:[#allocation2] sm:$0xff] %v579_v39  ;;  %603 = vst [vmem:[#allocation2 + $0x40] sm:$0xff] %v587_v40  ;;  %v580_v47 = vadd.f32 %v519_v45, %v419_v37  ;;  %v588_v48 = vadd.f32 %v551_v46, %v427_v38  ;;  %987 = vperm.xlu1 (!%p1233_p12), %1482, %v961_v27   ;;  %977 = vperm.xlu0 (!%p1233_p12), %1481, %v959_v29   ;;  %v962_v32 = vld [vmem:[%s1688_s15 + $0x18] sm:$0xff] (!%p1233_p12)  ;;  %v960_v33 = vld [vmem:[%s1688_s15 + $0x8] sm:$0xff] (!%p1233_p12) }
 0x12c   : > { %598 = vst [vmem:[#allocation2 + $0x18] sm:$0xff] %v582_v43  ;;  %606 = vst [vmem:[#allocation2 + $0x58] sm:$0xff] %v590_v44  ;;  %v1505_v34 = vld [vmem:[%s1683_s12 + $0x14] ss:$8 sps:$4 sm:$0xff] (!%p1233_p12)   ;;  %v964_v36 = vld [vmem:[%s1688_s15 + $0x28] sm:$0xff] (!%p1233_p12) }
 0x12d   : > { %596 = vst [vmem:[#allocation2 + $0x8] sm:$0xff] %v580_v47  ;;  %604 = vst [vmem:[#allocation2 + $0x48] sm:$0xff] %v588_v48  ;;  %1302 = vmatpush3.bf16.msra.mxu0 (!%p1233_p12), %v1498_v28  ;;  %1414 = vmatpush3.bf16.msra.mxu1 (!%p1233_p12), %v1498_v28  ;;  %v1507_v35 = vld [vmem:[%s1683_s12 + $0x54] ss:$8 sps:$4 sm:$0xff] (!%p1233_p12)   ;;  %v963_v37 = vld [vmem:[%s1688_s15 + $0x20] sm:$0xff] (!%p1233_p12) }
 0x12e   : > { %v1509_v38 = vld [vmem:[%s1683_s12 + $0x10] ss:$8 sps:$4 sm:$0xff] (!%p1233_p12)   ;;  %v1511_v42 = vld [vmem:[%s1683_s12 + $0x24] ss:$8 sps:$4 sm:$0xff] (!%p1233_p12)   ;;  %v1515_v46 = vld [vmem:[%s1683_s12 + $0x20] ss:$8 sps:$4 sm:$0xff] (!%p1233_p12)  }
 0x12f   : > { %v1373_v53 = vpop.f32.mrb[4].mxu0  ;;  %v1381_v54 = vpop.f32.mrb[4].mxu1  ;;  %614 = sbr.rel (%p1233_p12) target bundleno = 550 (0x226), region = 90  ;;  %992 = vperm.xlu1 (!%p1233_p12), %1482, %v962_v32   ;;  %982 = vperm.xlu0 (!%p1233_p12), %1481, %v960_v33   ;;  %v1510_v39 = vld [vmem:[%s1683_s12 + $0x50] ss:$8 sps:$4 sm:$0xff] (!%p1233_p12)   ;;  %v968_v44 = vld [vmem:[%s1688_s15 + $0x48] sm:$0xff] (!%p1233_p12) }
 0x130   : > { %v585_v57 = vadd.f32 %v1373_v53, %v424_v49  ;;  %v593_v58 = vadd.f32 %v1381_v54, %v432_v50  ;;  %v532_v59 = vpop.f32.mrb[5].mxu0  ;;  %v564_v60 = vpop.f32.mrb[5].mxu1  ;;  %895 = vmatmul.mubr.bf16.vlgmr.msra.gmra.mrb[0].mxu0 (!%p1233_p12), %v1499_v30  ;;  %927 = vmatmul.mubr.bf16.vlgmr.msra.gmra.mrb[0].mxu1 (!%p1233_p12), %v1502_v31  ;;  %v966_v40 = vld [vmem:[%s1688_s15 + $0x38] sm:$0xff] (!%p1233_p12)  ;;  %v965_v41 = vld [vmem:[%s1688_s15 + $0x30] sm:$0xff] (!%p1233_p12)  ;;  %v1513_v43 = vld [vmem:[%s1683_s12 + $0x64] ss:$8 sps:$4 sm:$0xff] (!%p1233_p12)  }
 0x131   : > { %v583_v63 = vadd.f32 %v532_v59, %v422_v51  ;;  %v591_v0 = vadd.f32 %v564_v60, %v430_v52  ;;  %v1374_v1 = vpop.f32.mrb[6].mxu0  ;;  %v1382_v2 = vpop.f32.mrb[6].mxu1  ;;  %902 = vmatprep.mubr.bf16.mxu0 (!%p1233_p12), %v1505_v34  ;;  %934 = vmatprep.mubr.bf16.mxu1 (!%p1233_p12), %v1507_v35  ;;  %v967_v45 = vld [vmem:[%s1688_s15 + $0x40] sm:$0xff] (!%p1233_p12)  ;;  %v970_v48 = vld [vmem:[%s1688_s15 + $0x58] sm:$0xff] (!%p1233_p12)  ;;  %v969_v49 = vld [vmem:[%s1688_s15 + $0x50] sm:$0xff] (!%p1233_p12) }
 0x132   : > { %601 = vst [vmem:[#allocation2 + $0x30] sm:$0xff] %v585_v57  ;;  %609 = vst [vmem:[#allocation2 + $0x70] sm:$0xff] %v593_v58  ;;  %v586_v3 = vadd.f32 %v1374_v1, %v425_v55  ;;  %v594_v4 = vadd.f32 %v1382_v2, %v433_v56  ;;  %v535_v5 = vpop.f32.mrb[7].mxu0  ;;  %v567_v6 = vpop.f32.mrb[7].mxu1  ;;  %v1516_v47 = vld [vmem:[%s1683_s12 + $0x60] ss:$8 sps:$4 sm:$0xff] (!%p1233_p12)  }
 0x133   : > { %599 = vst [vmem:[#allocation2 + $0x20] sm:$0xff] %v583_v63  ;;  %607 = vst [vmem:[#allocation2 + $0x60] sm:$0xff] %v591_v0  ;;  %v584_v7 = vadd.f32 %v535_v5, %v423_v61  ;;  %v592_v8 = vadd.f32 %v567_v6, %v431_v62  ;;  %1002 = vperm.xlu1 (!%p1233_p12), %1482, %v964_v36   ;;  %997 = vperm.xlu0 (!%p1233_p12), %1481, %v963_v37   ;;  %v1517_v50 = vld [vmem:[%s1683_s12 + $0x34] ss:$8 sps:$4 sm:$0xff] (!%p1233_p12)   ;;  %v972_v52 = vld [vmem:[%s1688_s15 + $0x68] sm:$0xff] (!%p1233_p12) }
 0x134   : > { %602 = vst [vmem:[#allocation2 + $0x38] sm:$0xff] %v586_v3  ;;  %610 = vst [vmem:[#allocation2 + $0x78] sm:$0xff] %v594_v4  ;;  %v1519_v51 = vld [vmem:[%s1683_s12 + $0x74] ss:$8 sps:$4 sm:$0xff] (!%p1233_p12)   ;;  %v971_v53 = vld [vmem:[%s1688_s15 + $0x60] sm:$0xff] (!%p1233_p12) }
 0x135   : > { %600 = vst [vmem:[#allocation2 + $0x28] sm:$0xff] %v584_v7  ;;  %608 = vst [vmem:[#allocation2 + $0x68] sm:$0xff] %v592_v8  ;;  %v1521_v54 = vld [vmem:[%s1683_s12 + $0x30] ss:$8 sps:$4 sm:$0xff] (!%p1233_p12)   ;;  %v615_v4 = vld [vmem:[#allocation2] sm:$0xff] (!%p1233_p12) }
 0x136   : > { %v1522_v55 = vld [vmem:[%s1683_s12 + $0x70] ss:$8 sps:$4 sm:$0xff]   ;;  %v623_v5 = vld [vmem:[#allocation2 + $0x40] sm:$0xff]  ;;  %v616_v11 = vld [vmem:[#allocation2 + $0x8] sm:$0xff] }
 0x137   : > { %1012 = vperm.xlu1 %1482, %v966_v40   ;;  %1007 = vperm.xlu0 %1481, %v965_v41   ;;  %v974_v56 = vld [vmem:[%s1688_s15 + $0x78] sm:$0xff]  ;;  %v973_v57 = vld [vmem:[%s1688_s15 + $0x70] sm:$0xff]  ;;  %v1810_v8 = vld [vmem:[%s1874_s4] ss:$0 sm:$0xff] }
 0x138   : > { %903 = vmatmul.mubr.bf16.gmra.mrb[4].mxu0 %v1509_v38  ;;  %935 = vmatmul.mubr.bf16.gmra.mrb[4].mxu1 %v1510_v39  ;;  %v624_v12 = vld [vmem:[#allocation2 + $0x48] sm:$0xff]  ;;  %v617_v33 = vld [vmem:[#allocation2 + $0x10] sm:$0xff]  ;;  %v618_v41 = vld [vmem:[#allocation2 + $0x18] sm:$0xff] }
 0x139   : > { %910 = vmatprep.mubr.bf16.mxu0 %v1511_v42  ;;  %942 = vmatprep.mubr.bf16.mxu1 %v1513_v43  ;;  %v625_v34 = vld [vmem:[#allocation2 + $0x50] sm:$0xff]  ;;  %v626_v42 = vld [vmem:[#allocation2 + $0x58] sm:$0xff] }
 0x13b   : > { %1022 = vperm.xlu1 %1482, %v968_v44   ;;  %1017 = vperm.xlu0 %1481, %v967_v45  }
 0x13f   : > { %1032 = vperm.xlu1 %1482, %v970_v48   ;;  %1027 = vperm.xlu0 %1481, %v969_v49  }
 0x140   : > { %911 = vmatmul.mubr.bf16.gmra.mrb[8].mxu0 %v1515_v46  ;;  %943 = vmatmul.mubr.bf16.gmra.mrb[8].mxu1 %v1516_v47 }
 0x141   : > { %918 = vmatprep.mubr.bf16.mxu0 %v1517_v50  ;;  %950 = vmatprep.mubr.bf16.mxu1 %v1519_v51 }
 0x143   : > { %1042 = vperm.xlu1 %1482, %v972_v52   ;;  %1037 = vperm.xlu0 %1481, %v971_v53  }
 0x147   : > { %1052 = vperm.xlu1 %1482, %v974_v56   ;;  %1047 = vperm.xlu0 %1481, %v973_v57  }
 0x148   : > { %919 = vmatmul.mubr.bf16.gmra.mrb[12].mxu0 %v1521_v54  ;;  %951 = vmatmul.mubr.bf16.gmra.mrb[12].mxu1 %v1522_v55 }
 0x1aa   : > { %v988_v58 = vpop.permute.xlu1 %987  ;;  %v978_v59 = vpop.permute.xlu0 %977 }
 0x1ab   : > { %v1055_v17 = vmul.f32 %v978_v59, %v615_v4  ;;  %v1057_v47 = vmul.f32 %v988_v58, %v617_v33  ;;  %v619_v4 = vld [vmem:[#allocation2 + $0x20] sm:$0xff]  ;;  %v621_v33 = vld [vmem:[#allocation2 + $0x30] sm:$0xff] }
 0x1ae   : > { %v1797_v60 = vpop.permute.xlu1 %992  ;;  %v983_v61 = vpop.permute.xlu0 %982 }
 0x1af   : > { %v1056_v25 = vmul.f32 %v983_v61, %v616_v11  ;;  %v1058_v55 = vmul.f32 %v1797_v60, %v618_v41  ;;  %v630_v41 = vld [vmem:[#allocation2 + $0x78] sm:$0xff] }
 0x1b2   : > { %v1799_v62 = vpop.permute.xlu1 %1002  ;;  %v1801_v63 = vpop.permute.xlu0 %997 }
 0x1b6   : > { %v1803_v0 = vpop.permute.xlu1 %1012  ;;  %v1805_v1 = vpop.permute.xlu0 %1007 }
 0x1ba   : > { %v1023_v2 = vpop.permute.xlu1 %1022  ;;  %v1018_v3 = vpop.permute.xlu0 %1017 }
 0x1bb   : > { %v1063_v18 = vmul.f32 %v1018_v3, %v623_v5  ;;  %v1064_v26 = vmul.f32 %v1023_v2, %v624_v12  ;;  %v627_v5 = vld [vmem:[#allocation2 + $0x60] sm:$0xff]  ;;  %v620_v12 = vld [vmem:[#allocation2 + $0x28] sm:$0xff] }
 0x1be   : > { %v1033_v31 = vpop.permute.xlu1 %1032  ;;  %v1028_v32 = vpop.permute.xlu0 %1027 }
 0x1bf   : > { %v1065_v48 = vmul.f32 %v1028_v32, %v625_v34  ;;  %v1066_v56 = vmul.f32 %v1033_v31, %v626_v42  ;;  %v629_v34 = vld [vmem:[#allocation2 + $0x70] sm:$0xff] }
 0x1c2   : > { %v1043_v2 = vpop.permute.xlu1 %1042  ;;  %v1038_v3 = vpop.permute.xlu0 %1037 }
 0x1c6   : > { %v1053_v31 = vpop.permute.xlu1 %1052  ;;  %v1048_v32 = vpop.permute.xlu0 %1047 }
 0x203   : > { %v1303_v6 = vpop.f32.mrb[0].mxu0  ;;  %v1327_v7 = vpop.f32.mrb[0].mxu1 }
 0x204   : > { %v1304_v9 = vpop.f32.mrb[1].mxu0  ;;  %v1328_v10 = vpop.f32.mrb[1].mxu1 }
 0x205   : > { %v1305_v13 = vadd.f32 %v1304_v9, %v1303_v6  ;;  %v1329_v14 = vadd.f32 %v1328_v10, %v1327_v7  ;;  %v1306_v15 = vpop.f32.mrb[2].mxu0  ;;  %v1330_v16 = vpop.f32.mrb[2].mxu1 }
 0x206   : > { %v1307_v19 = vpop.f32.mrb[3].mxu0  ;;  %v1331_v20 = vpop.f32.mrb[3].mxu1 }
 0x207   : > { %v897_v21 = vadd.f32 %v1305_v13, %v1810_v8  ;;  %v929_v22 = vadd.f32 %v1329_v14, %v1810_v8  ;;  %v1308_v23 = vadd.f32 %v1307_v19, %v1306_v15  ;;  %v1332_v24 = vadd.f32 %v1331_v20, %v1330_v16  ;;  %v628_v13 = vld [vmem:[#allocation2 + $0x68] sm:$0xff] }
 0x208   : > { %v1067_v19 = vmul.f32 %v1038_v3, %v627_v5 }
 0x209   : > { %v1071_v27 = vadd.f32 %v1055_v17, %v897_v21  ;;  %v1079_v28 = vadd.f32 %v1063_v18, %v929_v22  ;;  %v900_v29 = vadd.f32 %v1308_v23, %v1810_v8  ;;  %v932_v30 = vadd.f32 %v1332_v24, %v1810_v8 }
 0x20a   : > { %v1059_v18 = vmul.f32 %v1801_v63, %v619_v4 }
 0x20b   : > { %1087 = vst [vmem:[%s1693_s18] sm:$0xff] %v1071_v27  ;;  %1095 = vst [vmem:[%s1693_s18 + $0x40] sm:$0xff] %v1079_v28  ;;  %v1072_v35 = vadd.f32 %v1056_v25, %v900_v29  ;;  %v1080_v36 = vadd.f32 %v1064_v26, %v932_v30  ;;  %v1309_v37 = vpop.f32.mrb[4].mxu0  ;;  %v1333_v38 = vpop.f32.mrb[4].mxu1  ;;  %v1060_v26 = vmul.f32 %v1799_v62, %v620_v12 }
 0x20c   : > { %v1310_v39 = vpop.f32.mrb[5].mxu0  ;;  %v1334_v40 = vpop.f32.mrb[5].mxu1  ;;  %v1068_v27 = vmul.f32 %v1043_v2, %v628_v13 }
 0x20d   : > { %1088 = vst [vmem:[%s1693_s18 + $0x8] sm:$0xff] %v1072_v35  ;;  %1096 = vst [vmem:[%s1693_s18 + $0x48] sm:$0xff] %v1080_v36  ;;  %v1311_v43 = vadd.f32 %v1310_v39, %v1309_v37  ;;  %v1335_v44 = vadd.f32 %v1334_v40, %v1333_v38  ;;  %v1312_v45 = vpop.f32.mrb[6].mxu0  ;;  %v1336_v46 = vpop.f32.mrb[6].mxu1  ;;  %v622_v40 = vld [vmem:[#allocation2 + $0x38] sm:$0xff] }
 0x20e   : > { %v1313_v49 = vpop.f32.mrb[7].mxu0  ;;  %v1337_v50 = vpop.f32.mrb[7].mxu1 }
 0x20f   : > { %v905_v51 = vadd.f32 %v1311_v43, %v1810_v8  ;;  %v937_v52 = vadd.f32 %v1335_v44, %v1810_v8  ;;  %v1314_v53 = vadd.f32 %v1313_v49, %v1312_v45  ;;  %v1338_v54 = vadd.f32 %v1337_v50, %v1336_v46 }
 0x210   : > { %v1061_v46 = vmul.f32 %v1805_v1, %v621_v33 }
 0x211   : > { %v1073_v57 = vadd.f32 %v1057_v47, %v905_v51  ;;  %v1081_v59 = vadd.f32 %v1065_v48, %v937_v52  ;;  %v908_v61 = vadd.f32 %v1314_v53, %v1810_v8  ;;  %v940_v58 = vadd.f32 %v1338_v54, %v1810_v8 }
 0x212   : > { %v1069_v47 = vmul.f32 %v1048_v32, %v629_v34  ;;  %v1062_v54 = vmul.f32 %v1803_v0, %v622_v40 }
 0x213   : > { %1089 = vst [vmem:[%s1693_s18 + $0x10] sm:$0xff] %v1073_v57  ;;  %1097 = vst [vmem:[%s1693_s18 + $0x50] sm:$0xff] %v1081_v59  ;;  %v1074_v6 = vadd.f32 %v1058_v55, %v908_v61  ;;  %v1082_v7 = vadd.f32 %v1066_v56, %v940_v58  ;;  %v1315_v9 = vpop.f32.mrb[8].mxu0  ;;  %v1339_v10 = vpop.f32.mrb[8].mxu1  ;;  %v1070_v55 = vmul.f32 %v1053_v31, %v630_v41 }
 0x214   : > { %v1316_v60 = vpop.f32.mrb[9].mxu0  ;;  %v1340_v11 = vpop.f32.mrb[9].mxu1 }
 0x215   : > { %1090 = vst [vmem:[%s1693_s18 + $0x18] sm:$0xff] %v1074_v6  ;;  %1098 = vst [vmem:[%s1693_s18 + $0x58] sm:$0xff] %v1082_v7  ;;  %v1317_v14 = vadd.f32 %v1316_v60, %v1315_v9  ;;  %v1341_v15 = vadd.f32 %v1340_v11, %v1339_v10  ;;  %v1318_v16 = vpop.f32.mrb[10].mxu0  ;;  %v1342_v17 = vpop.f32.mrb[10].mxu1 }
 0x216   : > { %v1319_v20 = vpop.f32.mrb[11].mxu0  ;;  %v1343_v21 = vpop.f32.mrb[11].mxu1 }
 0x217   : > { %v913_v22 = vadd.f32 %v1317_v14, %v1810_v8  ;;  %v945_v23 = vadd.f32 %v1341_v15, %v1810_v8  ;;  %v1320_v24 = vadd.f32 %v1319_v20, %v1318_v16  ;;  %v1344_v25 = vadd.f32 %v1343_v21, %v1342_v17 }
 0x219   : > { %v1075_v28 = vadd.f32 %v1059_v18, %v913_v22  ;;  %v1083_v29 = vadd.f32 %v1067_v19, %v945_v23  ;;  %v916_v30 = vadd.f32 %v1320_v24, %v1810_v8  ;;  %v948_v63 = vadd.f32 %v1344_v25, %v1810_v8 }
 0x21b   : > { %1091 = vst [vmem:[%s1693_s18 + $0x20] sm:$0xff] %v1075_v28  ;;  %1099 = vst [vmem:[%s1693_s18 + $0x60] sm:$0xff] %v1083_v29  ;;  %v1076_v35 = vadd.f32 %v1060_v26, %v916_v30  ;;  %v1084_v36 = vadd.f32 %v1068_v27, %v948_v63  ;;  %v1321_v37 = vpop.f32.mrb[12].mxu0  ;;  %v1345_v38 = vpop.f32.mrb[12].mxu1 }
 0x21c   : > { %v1322_v62 = vpop.f32.mrb[13].mxu0  ;;  %v1346_v39 = vpop.f32.mrb[13].mxu1 }
 0x21d   : > { %1092 = vst [vmem:[%s1693_s18 + $0x28] sm:$0xff] %v1076_v35  ;;  %1100 = vst [vmem:[%s1693_s18 + $0x68] sm:$0xff] %v1084_v36  ;;  %v1323_v42 = vadd.f32 %v1322_v62, %v1321_v37  ;;  %v1347_v43 = vadd.f32 %v1346_v39, %v1345_v38  ;;  %v1324_v44 = vpop.f32.mrb[14].mxu0  ;;  %v1348_v45 = vpop.f32.mrb[14].mxu1 }
 0x21e   : > { %v1325_v48 = vpop.f32.mrb[15].mxu0  ;;  %v1349_v49 = vpop.f32.mrb[15].mxu1 }
 0x21f   : > { %v921_v50 = vadd.f32 %v1323_v42, %v1810_v8  ;;  %v953_v51 = vadd.f32 %v1347_v43, %v1810_v8  ;;  %v1326_v52 = vadd.f32 %v1325_v48, %v1324_v44  ;;  %v1350_v53 = vadd.f32 %v1349_v49, %v1348_v45 }
 0x221   : > { %v1077_v56 = vadd.f32 %v1061_v46, %v921_v50  ;;  %v1085_v57 = vadd.f32 %v1069_v47, %v953_v51  ;;  %v924_v59 = vadd.f32 %v1326_v52, %v1810_v8  ;;  %v956_v1 = vadd.f32 %v1350_v53, %v1810_v8 }
 0x223   : > { %1093 = vst [vmem:[%s1693_s18 + $0x30] sm:$0xff] %v1077_v56  ;;  %1101 = vst [vmem:[%s1693_s18 + $0x70] sm:$0xff] %v1085_v57  ;;  %v1078_v61 = vadd.f32 %v1062_v54, %v924_v59  ;;  %v1086_v58 = vadd.f32 %v1070_v55, %v956_v1 }
 0x225   : > { %1094 = vst [vmem:[%s1693_s18 + $0x38] sm:$0xff] %v1078_v61  ;;  %1102 = vst [vmem:[%s1693_s18 + $0x78] sm:$0xff] %v1086_v58 }
 0x226 PF: > { %s16_s27 = sadd.s32 1, %s1577_s27   ;;  %s1877_s21 = smov %s1557_s22 }
 0x227   : > { %p13_p13 = scmp.ge.s32.totalorder %s16_s27, 6   ;;  %s1878_s22 = smov %s1667_s10 }
 0x228   : > { %s1879_s23 = smov %s1569_s25  ;;  %s1880_s24 = smov %s1573_s26 }
 0x229   : > { %s1881_s25 = smov %s1884_s28  ;;  %s1882_s26 = smov %s1888_s29 }
 0x22a   :  { %15 = sbr.rel (!%p13_p13) target bundleno = 4 (0x4), region = 132 }

</bundles_post_ra>
